<compile_context>
chip_gen: v5e
topology: v5e:2x2
jax: 0.10.0
libtpu: 0.0.40
codegen_flags: <defaults>
</compile_context>

<pallas_src>
import functools

import jax
import jax.numpy as jnp
from jax.experimental import pallas as pl
from jax.experimental.pallas import tpu as pltpu


# ----------------------------- activations --------------------------------

def _quick_gelu(x):
    # CLIP's QuickGELU (the act_layer used with this MLP in the CLIP text/vision towers).
    return x * jax.nn.sigmoid(1.702 * x)


def _gelu(x):
    return jax.nn.gelu(x, approximate=False)


_ACTS = {"quick_gelu": _quick_gelu, "gelu": _gelu}


# ----------------------------- Pallas kernel -------------------------------

def mlp_kernel(x_ref, w_in_ref, b_in_ref, w_out_ref, b_out_ref, o_ref, *, act):
    """One (TM, D) tile of tokens through in_proj -> act -> out_proj.

    x_ref:     [TM, D]  f32 activation tile
    w_in_ref:  [D, H]   bf16 (in_proj.weight pre-transposed)
    b_in_ref:  [1, H]   f32
    w_out_ref: [H, D]   bf16 (out_proj.weight pre-transposed)
    b_out_ref: [1, D]   f32
    o_ref:     [TM, D]  f32
    """
    x = x_ref[...]
    # in_proj: bf16 MXU matmul, f32 accumulate.
    h = jnp.dot(x.astype(jnp.bfloat16), w_in_ref[...],
                preferred_element_type=jnp.float32) + b_in_ref[...]
    h = act(h)
    # out_proj
    y = jnp.dot(h.astype(jnp.bfloat16), w_out_ref[...],
                preferred_element_type=jnp.float32) + b_out_ref[...]
    o_ref[...] = y.astype(o_ref.dtype)


# ----------------------------- wrapper -------------------------------------

def peft_mlp_forward(x, params, *, act="quick_gelu", tm=128):
    """PEFT_MLP.forward with no active tuners.  x: [..., D] -> [..., D]."""
    orig_shape = x.shape
    D = orig_shape[-1]
    H = params["w_in"].shape[0]

    n = 1
    for s in orig_shape[:-1]:
        n *= s
    xf = x.reshape(n, D).astype(jnp.float32)

    # Pad the flattened token axis up to a multiple of the row tile.
    n_pad = -n % tm
    if n_pad:
        xf = jnp.concatenate([xf, jnp.zeros((n_pad, D), xf.dtype)], axis=0)
    n_tot = xf.shape[0]

    # Weight prep (one-time in practice): transpose to input-major so the
    # kernel computes x @ W^T, and cast to bf16 for HBM/MXU.  Biases stay f32.
    w_in_t = params["w_in"].T.astype(jnp.bfloat16)      # [D, H]
    w_out_t = params["w_out"].T.astype(jnp.bfloat16)    # [H, D]
    b_in = params["b_in"].reshape(1, H).astype(jnp.float32)
    b_out = params["b_out"].reshape(1, D).astype(jnp.float32)

    kern = functools.partial(mlp_kernel, act=_ACTS[act])
    out = pl.pallas_call(
        kern,
        out_shape=jax.ShapeDtypeStruct((n_tot, D), jnp.float32),
        grid=(n_tot // tm,),
        in_specs=[
            pl.BlockSpec((tm, D), lambda i: (i, 0)),     # activation tile
            pl.BlockSpec((D, H), lambda i: (0, 0)),      # w_in^T  (resident)
            pl.BlockSpec((1, H), lambda i: (0, 0)),      # b_in
            pl.BlockSpec((H, D), lambda i: (0, 0)),      # w_out^T (resident)
            pl.BlockSpec((1, D), lambda i: (0, 0)),      # b_out
        ],
        out_specs=pl.BlockSpec((tm, D), lambda i: (i, 0)),
        compiler_params=pltpu.CompilerParams(
            dimension_semantics=("parallel",),
            vmem_limit_bytes=32 * 1024 * 1024,
        ),
    )(xf, w_in_t, b_in, w_out_t, b_out)

    if n_pad:
        out = out[:n]
    return out.reshape(orig_shape[:-1] + (D,))


# ----------------------------- pure-JAX reference --------------------------

def ref_forward(x, params, *, act="quick_gelu"):
    """f32 reference matching the PyTorch module (Linear -> act -> Linear)."""
    xf = x.astype(jnp.float32)
    h = xf @ params["w_in"].T.astype(jnp.float32) + params["b_in"].astype(jnp.float32)
    h = _ACTS[act](h)
    return h @ params["w_out"].T.astype(jnp.float32) + params["b_out"].astype(jnp.float32)


# ----------------------------- param init ----------------------------------

def init_params(key, *, dim, mlp_dim):
    k0, k1, k2, k3 = jax.random.split(key, 4)
    std = 0.02
    return {
        # stored in torch nn.Linear layout: weight [out_features, in_features]
        "w_in": std * jax.random.normal(k0, (mlp_dim, dim), jnp.float32),
        "b_in": 0.01 * jax.random.normal(k1, (mlp_dim,), jnp.float32),
        "w_out": std * jax.random.normal(k2, (dim, mlp_dim), jnp.float32),
        "b_out": 0.01 * jax.random.normal(k3, (dim,), jnp.float32),
    }


# ----------------------------- main -----------------------------------------

if __name__ == "__main__":
    # Small but lane-/MXU-friendly shapes: D multiple of 128, 4 grid steps.
    B, S, D = 4, 128, 128
    MLP_DIM = 4 * D

    key = jax.random.PRNGKey(0)
    k_p, k_x = jax.random.split(key)
    params = init_params(k_p, dim=D, mlp_dim=MLP_DIM)
    x = jax.random.normal(k_x, (B, S, D), jnp.float32)

    out = peft_mlp_forward(x, params, act="quick_gelu", tm=128)
    out = jax.block_until_ready(out)

    ref = ref_forward(x, params, act="quick_gelu")
    assert out.shape == ref.shape == (B, S, D)
    # bf16 weight/activation casts inside the kernel (f32 accumulate) vs a pure
    # f32 reference -> loose-ish tolerance; observed error is ~1e-3 absolute.
    assert jnp.allclose(out, ref, atol=5e-3, rtol=5e-2), "mismatch vs pure-JAX reference"

    print("KERNEL_OK")
</pallas_src>

<mosaic_0001>
module attributes {stable_mosaic.version = 11 : i64} {
  func.func @mlp_kernel(%arg0: i32, %arg1: memref<128x128xf32, #tpu.memory_space<vmem>>, %arg2: memref<128x512xbf16, #tpu.memory_space<vmem>>, %arg3: memref<1x512xf32, #tpu.memory_space<vmem>>, %arg4: memref<512x128xbf16, #tpu.memory_space<vmem>>, %arg5: memref<1x128xf32, #tpu.memory_space<vmem>>, %arg6: memref<128x128xf32, #tpu.memory_space<vmem>>) attributes {dimension_semantics = [#tpu.dimension_semantics<parallel>], iteration_bounds = array<i64: 4>, scalar_prefetch = 0 : i64, scratch_operands = 0 : i64, tpu.core_type = #tpu.core_type<tc>, window_params = [{transform_indices = @transform_0, window_bounds = array<i64: 128, 128>}, {pipeline_mode = #tpu.pipeline_mode<synchronous>, transform_indices = @transform_1, window_bounds = array<i64: 128, 512>}, {pipeline_mode = #tpu.pipeline_mode<synchronous>, transform_indices = @transform_2, window_bounds = array<i64: 1, 512>}, {pipeline_mode = #tpu.pipeline_mode<synchronous>, transform_indices = @transform_3, window_bounds = array<i64: 512, 128>}, {pipeline_mode = #tpu.pipeline_mode<synchronous>, transform_indices = @transform_4, window_bounds = array<i64: 1, 128>}, {transform_indices = @transform_5, window_bounds = array<i64: 128, 128>}]} {
    %c0 = arith.constant 0 : index
    %c0_0 = arith.constant 0 : index
    %0 = vector.load %arg1[%c0, %c0_0] : memref<128x128xf32, #tpu.memory_space<vmem>>, vector<128x128xf32>
    %1 = arith.truncf %0 : vector<128x128xf32> to vector<128x128xbf16>
    %c0_1 = arith.constant 0 : index
    %c0_2 = arith.constant 0 : index
    %2 = vector.load %arg2[%c0_1, %c0_2] : memref<128x512xbf16, #tpu.memory_space<vmem>>, vector<128x512xbf16>
    %cst = arith.constant dense<0.000000e+00> : vector<128x512xf32>
    %3 = tpu.matmul %1, %2, %cst {dimension_numbers = #tpu.dot_dimension_numbers<[1], [0], [0], [1], [0, 0, 1, 1], [], []>} : vector<128x128xbf16>, vector<128x512xbf16>, vector<128x512xf32> -> vector<128x512xf32>
    %c0_3 = arith.constant 0 : index
    %c0_4 = arith.constant 0 : index
    %4 = vector.load %arg3[%c0_3, %c0_4] : memref<1x512xf32, #tpu.memory_space<vmem>>, vector<1x512xf32>
    %5 = vector.broadcast %4 : vector<1x512xf32> to vector<128x512xf32>
    %6 = arith.addf %3, %5 : vector<128x512xf32>
    %cst_5 = arith.constant 1.702000e+00 : f32
    %7 = vector.broadcast %cst_5 : f32 to vector<128x512xf32>
    %8 = arith.mulf %7, %6 : vector<128x512xf32>
    %9 = arith.negf %8 : vector<128x512xf32>
    %10 = math.exp %9 : vector<128x512xf32>
    %cst_6 = arith.constant 1.000000e+00 : f32
    %11 = vector.broadcast %cst_6 : f32 to vector<128x512xf32>
    %12 = arith.addf %11, %10 : vector<128x512xf32>
    %13 = arith.divf %11, %12 : vector<128x512xf32>
    %14 = arith.mulf %6, %13 : vector<128x512xf32>
    %15 = arith.truncf %14 : vector<128x512xf32> to vector<128x512xbf16>
    %c0_7 = arith.constant 0 : index
    %c0_8 = arith.constant 0 : index
    %16 = vector.load %arg4[%c0_7, %c0_8] : memref<512x128xbf16, #tpu.memory_space<vmem>>, vector<512x128xbf16>
    %cst_9 = arith.constant dense<0.000000e+00> : vector<128x128xf32>
    %17 = tpu.matmul %15, %16, %cst_9 {dimension_numbers = #tpu.dot_dimension_numbers<[1], [0], [0], [1], [0, 0, 1, 1], [], []>} : vector<128x512xbf16>, vector<512x128xbf16>, vector<128x128xf32> -> vector<128x128xf32>
    %c0_10 = arith.constant 0 : index
    %c0_11 = arith.constant 0 : index
    %18 = vector.load %arg5[%c0_10, %c0_11] : memref<1x128xf32, #tpu.memory_space<vmem>>, vector<1x128xf32>
    %19 = vector.broadcast %18 : vector<1x128xf32> to vector<128x128xf32>
    %20 = arith.addf %17, %19 : vector<128x128xf32>
    %c0_12 = arith.constant 0 : index
    %c0_13 = arith.constant 0 : index
    %21 = vector.load %arg6[%c0_12, %c0_13] : memref<128x128xf32, #tpu.memory_space<vmem>>, vector<128x128xf32>
    tpu.vector_store %arg6[%c0_12, %c0_13], %20 {strides = array<i32>} : memref<128x128xf32, #tpu.memory_space<vmem>>, vector<128x128xf32>,
    return
  }
  func.func @transform_0(%arg0: i32) -> (i32, i32) {
    %c0_i32 = arith.constant 0 : i32
    %c0_i32_0 = arith.constant 0 : i32
    return %arg0, %c0_i32 : i32, i32
  }
  func.func @transform_1(%arg0: i32) -> (i32, i32) {
    %c0_i32 = arith.constant 0 : i32
    %c0_i32_0 = arith.constant 0 : i32
    %c0_i32_1 = arith.constant 0 : i32
    return %c0_i32, %c0_i32_0 : i32, i32
  }
  func.func @transform_2(%arg0: i32) -> (i32, i32) {
    %c0_i32 = arith.constant 0 : i32
    %c0_i32_0 = arith.constant 0 : i32
    %c0_i32_1 = arith.constant 0 : i32
    return %c0_i32, %c0_i32_0 : i32, i32
  }
  func.func @transform_3(%arg0: i32) -> (i32, i32) {
    %c0_i32 = arith.constant 0 : i32
    %c0_i32_0 = arith.constant 0 : i32
    %c0_i32_1 = arith.constant 0 : i32
    return %c0_i32, %c0_i32_0 : i32, i32
  }
  func.func @transform_4(%arg0: i32) -> (i32, i32) {
    %c0_i32 = arith.constant 0 : i32
    %c0_i32_0 = arith.constant 0 : i32
    %c0_i32_1 = arith.constant 0 : i32
    return %c0_i32, %c0_i32_0 : i32, i32
  }
  func.func @transform_5(%arg0: i32) -> (i32, i32) {
    %c0_i32 = arith.constant 0 : i32
    %c0_i32_0 = arith.constant 0 : i32
    return %arg0, %c0_i32 : i32, i32
  }
}

</mosaic_0001>

<bundles_post_ra>
// kernel: tpu_custom_call.1
= control target key start
LH: loop header
LB: loop body
LE: loop exit
PB: predicated region body
PF: predicated region fallthrough
CT: control target
= control target key end

     0   :  { %10 = vsyncpa [#allocation3], 0  ;;  %s6122_s0 = inlined_call_operand.hbm [shape: f32[512,128], index: 0, kind: input, shape index: {}]   ;;  %s6123_s1 = inlined_call_operand.hbm [shape: bf16[128,512], index: 1, kind: input, shape index: {}]   ;;  %s6124_s2 = inlined_call_operand.hbm [shape: f32[1,512], index: 2, kind: input, shape index: {}]   ;;  %s6125_s3 = inlined_call_operand.hbm [shape: bf16[512,128], index: 3, kind: input, shape index: {}]   ;;  %s6126_s4 = inlined_call_operand.vmem [shape: f32[1,128], index: 4, kind: input, shape index: {}]   ;;  %s6127_s5 = inlined_call_operand.hbm [shape: f32[512,128], index: 5, kind: output, shape index: {}]  }
   0x1   :  { %12 = vsyncpa [#allocation3 + $0x1], 0 }
   0x2   :  { %13 = vsyncpa [#allocation6], 0 }
   0x3   :  { %14 = vsyncpa [#allocation9], 0 }
   0x4   :  { %15 = vsyncpa [#allocation4], 0 }
   0x5   :  { %17 = vsyncpa [#allocation4 + $0x1], 0  ;;  %s3668_s18 = smov 0   ;;  %s3670_s19 = smov 0  }
   0x6   :  { %s3672_s20 = smov 0   ;;  %s3674_s21 = smov 0  }
   0x7 LB: > { %s3689_s22 = sadd.s32 4294967295, %s3625_s21   ;;  %s2683_s23 = sadd.s32 4294967294, %s3625_s21   ;;  %s3625_s21 = sphi %s3674_s21, %s6376_s21   ;;  %s3621_s20 = sphi %s3672_s20, %s6375_s20   ;;  %s3617_s19 = sphi %s3670_s19, %s6374_s19   ;;  %s3613_s18 = sphi %s3668_s18, %s6373_s18  }
   0x8   : > { %p43_p0 = scmp.ne.s32.totalorder %s3617_s19, %s3613_s18  ;;  %p44_p1 = scmp.eq.s32.totalorder %s3689_s22, 0 }
   0x9   : > { %p151_p2 = scmp.eq.s32.totalorder %s3689_s22, 3  ;;  %p157_p3 = scmp.eq.s32.totalorder %s2683_s23, 3 }
   0xa   : > { %p3698_p4 = por %p44_p1, %p43_p0  ;;  %p2684_p5 = scmp.ge.s32.totalorder %s3625_s21, 1 }
   0xb   : > { %p3703_p6 = por %p157_p3, %p43_p0  ;;  %p164_p7 = scmp.lt.s32.totalorder %s3625_s21, 5 }
   0xc   : > { %s175_s28 = sshll.u32 %s6123_s1, 4  ;;  %s3627_s30 = smov [#allocation5]   ;;  %s176_s28 = int_to_ptr.hbm [resolvable:$true] %s175_s28 }
   0xd   : > { %p3711_p8 = pnand %p2684_p5, %p164_p7  ;;  %s177_s6 = sshll.u32 %s3627_s30, 4  ;;  %s178_s6 = int_to_ptr.vmem [resolvable:$true] %s177_s6 }
   0xe   : > { %s190_s10 = sshll.u32 %s6124_s2, 4  ;;  %s3628_s11 = smov 256   ;;  %s191_s10 = int_to_ptr.hbm [resolvable:$true] %s190_s10 }
   0xf   : > { %p3105_p9 = pneg %p3711_p8  ;;  %s3629_s12 = smov 16  }
  0x10   : > { %s3630_s13 = smov [#allocation7]   ;;  %s201_s17 = sshll.u32 %s6125_s3, 4  ;;  %s202_s17 = int_to_ptr.hbm [resolvable:$true] %s201_s17 }
  0x11   : > { %p3719_p10 = pnand %p3105_p9, %p44_p1  ;;  %s192_s14 = sshll.u32 %s3630_s13, 4  ;;  %s193_s14 = int_to_ptr.vmem [resolvable:$true] %s192_s14 }
  0x12   : > { %s3631_s23 = smov [#allocation8]   ;;  %s3632_s27 = smov 64  }
  0x13   : > { %3108 = dma.hbm_to_vmem [thread:$0]  (!%p3719_p10), %s176_s28, 4096, %s178_s6, [#allocation6], %s3628_s11, %s3628_s11, %s3629_s12  }
  0x14   : > { %3111 = dma.hbm_to_vmem [thread:$0]  (!%p3719_p10), %s191_s10, 64, %s193_s14, [#allocation6]  }
  0x15   : > { %s203_s26 = sshll.u32 %s3631_s23, 4  ;;  %s3633_s28 = smov 4   ;;  %s204_s26 = int_to_ptr.vmem [resolvable:$true] %s203_s26 }
  0x16   : > { %3114 = dma.hbm_to_vmem [thread:$0]  (!%p3719_p10), %s202_s17, 4096, %s204_s26, [#allocation9], %s3632_s27, %s3632_s27, %s3633_s28  }
  0x17   : > { %s3736_s30 = sadd.s32 1, %s3625_s21   ;;  %s30_s8 = sadd.s32 1, %s3621_s20 }
  0x18   : > { %s27_s6 = ssub.s32 %s3625_s21, %s3736_s30  ;;  %p37_p12 = scmp.ne.s32.totalorder %s3621_s20, %s3617_s19 }
  0x19   : > { %p28_p11 = scmp.eq.s32.totalorder %s27_s6, 0  ;;  %p38_p13 = scmp.eq.s32.totalorder %s3625_s21, 0 }
  0x1a   : > { %p3126_p0 = scmp.lt.s32.totalorder %s3625_s21, 4  ;;  %p3750_p5 = por %p151_p2, %p37_p12 }
  0x1b   : > { %s3746_s9 = scalar_select %p28_p11, %s3621_s20, %s30_s8  }
  0x1c   : > { %p39_p3 = por %p38_p13, %p37_p12  ;;  %s220_s7 = sand.u32 1, %s3621_s20  }
  0x1d   : > { %s3023_s11 = sshll.u32 %s3625_s21, 7  ;;  %s2689_s12 = sshll.u32 %s220_s7, 7 }
  0x1e   : > { %s229_s15 = scalar_lea.hbm %s6122_s0, %s3023_s11  ;;  %s224_s17 = scalar_lea.vmem [#allocation2], %s2689_s12 }
  0x1f   : > { %s230_s16 = sshll.u32 %s229_s15, 4  ;;  %s232_s23 = sshll.u32 %s224_s17, 4  ;;  %s231_s16 = int_to_ptr.hbm [resolvable:$true] %s230_s16  ;;  %s233_s23 = int_to_ptr.vmem [resolvable:$true] %s232_s23 }
  0x20   : > { %p3761_p7 = pnand %p3126_p0, %p39_p3  ;;  %s221_s27 = scalar_lea.sflag [#allocation3], %s220_s7 }
  0x21   : > { %s3521_s28 = sshra.s32 %s231_s16, 4  ;;  %s3528_s12 = scalar_lea.hbm %s6122_s0, 512  ;;  %s3522_s28 = int_to_ptr.hbm [resolvable:$true] %s3521_s28 }
  0x22   : > { %s3523_s6 = scalar_lea.hbm %s3522_s28, 128  ;;  %p3525_p9 = pneg %p3761_p7 }
  0x23   : > { %p3524_p2 = scmp.ne.s32.totalorder %s3522_s28, %s3523_s6  ;;  %p3529_p12 = scmp.lt.s32.totalorder %s3522_s28, %s6122_s0 }
  0x24   : > { %p3530_p13 = scmp.lt.s32.totalorder %s3528_s12, %s3523_s6 }
  0x25   : > { %p3526_p10 = pnand %p3525_p9, %p3524_p2 }
  0x26   : > { %p3531_p0 = por %p3530_p13, %p3529_p12 }
  0x27   : > { %p3527_p11 = pneg %p3526_p10 }
  0x29   : > { %p3532_p3 = pnand %p3531_p0, %p3527_p11 }
  0x2b   : > { %3535 = shalt.err (!%p3532_p3)
}
  0x2c   : > { %s3634_s7 = smov 128   ;;  %s3635_s15 = smov 8  }
  0x2d   : > { %3118 = dma.hbm_to_vmem [thread:$0]  (!%p3761_p7), %s231_s16, 2048, %s233_s23, %s221_s27, %s3634_s7, %s3634_s7, %s3635_s15  }
  0x2e   : > { %244 = sbr.rel (%p3711_p8) target bundleno = 697 (0x2b9), region = 40 }
  0x33   : > { %s3778_s17 = sand.u32 1, %s3617_s19  }
  0x34   : > { %s2693_s28 = sshll.u32 %s3778_s17, 7  ;;  %s247_s6 = scalar_lea.sflag [#allocation3], %s3778_s17 }
  0x35   : > { %s3784_s8 = scalar_lea.vmem [#allocation2], %s2693_s28 }
  0x36   : > { %3596 = dma.done.wait (%p3698_p4), %s247_s6, 2048  }
  0x37   : > { %3598 = vsyncadd (%p3698_p4), %s247_s6, 4294965248 }
  0x38   : > { %3600 = dma.done.wait (%p44_p1), [#allocation6], 4160  }
  0x39   : > { %3602 = vsyncadd (%p44_p1), [#allocation6], 4294963136 }
  0x3a   : > { %3604 = dma.done.wait (%p44_p1), [#allocation9], 4096  }
  0x3b   : > { %3606 = vsyncadd (%p44_p1), [#allocation9], 4294963200  ;;  %v2812_v0 = vld [vmem:[#allocation5 + $0xe0] sm:$0xf]  ;;  %v3054_v1 = vld [vmem:[#allocation5 + $0xec] sm:$0xf0] }
  0x3c   : > { %v3052_v2 = vld [vmem:[#allocation5 + $0xe4] sm:$0xf]  ;;  %v2813_v3 = vor.u32 %v3054_v1, %v2812_v0  ;;  %v2814_v4 = vld [vmem:[#allocation5 + $0xf0] sm:$0xf0]  ;;  %v2820_v5 = vld [vmem:[#allocation5 + $0xe8] sm:$0xf] }
  0x3d   : > { %v3055_v6 = vld [vmem:[#allocation5 + $0xf4] sm:$0xf0]  ;;  %v2817_v7 = vor.u32 %v3052_v2, %v2814_v4  ;;  %v3053_v9 = vld [vmem:[#allocation5 + $0xec] sm:$0xf]  ;;  %v2822_v10 = vld [vmem:[#allocation5 + $0xf8] sm:$0xf0] }
  0x3e   : > { %v2821_v8 = vor.u32 %v3055_v6, %v2820_v5  ;;  %v2796_v11 = vld [vmem:[#allocation5 + $0xc0] sm:$0xf]  ;;  %521 = vmatpush.bf16.msra.mxu0 %v2813_v3  ;;  %v2825_v12 = vor.u32 %v3053_v9, %v2822_v10  ;;  %v3050_v13 = vld [vmem:[#allocation5 + $0xcc] sm:$0xf0]  ;;  %v3048_v14 = vld [vmem:[#allocation5 + $0xc4] sm:$0xf] }
  0x3f   : > { %v2798_v15 = vld [vmem:[#allocation5 + $0xd0] sm:$0xf0]  ;;  %570 = vmatpush.bf16.msra.mxu1 %v2817_v7  ;;  %v2797_v16 = vor.u32 %v3050_v13, %v2796_v11  ;;  %v2804_v18 = vld [vmem:[#allocation5 + $0xc8] sm:$0xf]  ;;  %v3051_v19 = vld [vmem:[#allocation5 + $0xd4] sm:$0xf0] }
  0x40   : > { %619 = vmatpush.bf16.msra.mxu2 %v2821_v8  ;;  %v2801_v17 = vor.u32 %v3048_v14, %v2798_v15  ;;  %v3049_v20 = vld [vmem:[#allocation5 + $0xcc] sm:$0xf]  ;;  %668 = vmatpush.bf16.msra.mxu3 %v2825_v12  ;;  %v2805_v21 = vor.u32 %v3051_v19, %v2804_v18  ;;  %v2806_v22 = vld [vmem:[#allocation5 + $0xd8] sm:$0xf0]  ;;  %v2780_v23 = vld [vmem:[#allocation5 + $0xa0] sm:$0xf] }
  0x41   : > { %v3046_v24 = vld [vmem:[#allocation5 + $0xac] sm:$0xf0]  ;;  %v2809_v25 = vor.u32 %v3049_v20, %v2806_v22  ;;  %v3044_v26 = vld [vmem:[#allocation5 + $0xa4] sm:$0xf]  ;;  %v2782_v27 = vld [vmem:[#allocation5 + $0xb0] sm:$0xf0] }
  0x42   : > { %v2788_v28 = vld [vmem:[#allocation5 + $0xa8] sm:$0xf]  ;;  %522 = vmatpush.bf16.msra.mxu0 %v2797_v16  ;;  %v2781_v29 = vor.u32 %v3046_v24, %v2780_v23  ;;  %v3047_v30 = vld [vmem:[#allocation5 + $0xb4] sm:$0xf0]  ;;  %v3045_v31 = vld [vmem:[#allocation5 + $0xac] sm:$0xf]  ;;  %v2785_v33 = vor.u32 %v3044_v26, %v2782_v27 }
  0x43   : > { %v2790_v32 = vld [vmem:[#allocation5 + $0xb8] sm:$0xf0]  ;;  %571 = vmatpush.bf16.msra.mxu1 %v2801_v17  ;;  %v2789_v34 = vor.u32 %v3047_v30, %v2788_v28  ;;  %v2764_v35 = vld [vmem:[#allocation5 + $0x80] sm:$0xf]  ;;  %v3042_v36 = vld [vmem:[#allocation5 + $0x8c] sm:$0xf0] }
  0x44   : > { %620 = vmatpush.bf16.msra.mxu2 %v2805_v21  ;;  %v3040_v37 = vld [vmem:[#allocation5 + $0x84] sm:$0xf]  ;;  %669 = vmatpush.bf16.msra.mxu3 %v2809_v25  ;;  %v2793_v38 = vor.u32 %v3045_v31, %v2790_v32  ;;  %v2766_v39 = vld [vmem:[#allocation5 + $0x90] sm:$0xf0]  ;;  %v2772_v40 = vld [vmem:[#allocation5 + $0x88] sm:$0xf]  ;;  %v2765_v44 = vor.u32 %v3042_v36, %v2764_v35 }
  0x45   : > { %v3043_v41 = vld [vmem:[#allocation5 + $0x94] sm:$0xf0]  ;;  %v3041_v42 = vld [vmem:[#allocation5 + $0x8c] sm:$0xf]  ;;  %v2774_v43 = vld [vmem:[#allocation5 + $0x98] sm:$0xf0]  ;;  %v2769_v45 = vor.u32 %v3040_v37, %v2766_v39 }
  0x46   : > { %523 = vmatpush.bf16.msra.mxu0 %v2781_v29  ;;  %v2773_v46 = vor.u32 %v3043_v41, %v2772_v40  ;;  %v2748_v47 = vld [vmem:[#allocation5 + $0x60] sm:$0xf]  ;;  %v3038_v48 = vld [vmem:[#allocation5 + $0x6c] sm:$0xf0]  ;;  %v3036_v49 = vld [vmem:[#allocation5 + $0x64] sm:$0xf]  ;;  %v2777_v50 = vor.u32 %v3041_v42, %v2774_v43 }
  0x47   : > { %572 = vmatpush.bf16.msra.mxu1 %v2785_v33  ;;  %v2750_v51 = vld [vmem:[#allocation5 + $0x70] sm:$0xf0]  ;;  %v2756_v52 = vld [vmem:[#allocation5 + $0x68] sm:$0xf]  ;;  %v3039_v53 = vld [vmem:[#allocation5 + $0x74] sm:$0xf0]  ;;  %v2749_v56 = vor.u32 %v3038_v48, %v2748_v47 }
  0x48   : > { %621 = vmatpush.bf16.msra.mxu2 %v2789_v34  ;;  %670 = vmatpush.bf16.msra.mxu3 %v2793_v38  ;;  %v3037_v54 = vld [vmem:[#allocation5 + $0x6c] sm:$0xf]  ;;  %v2758_v55 = vld [vmem:[#allocation5 + $0x78] sm:$0xf0]  ;;  %v2753_v57 = vor.u32 %v3036_v49, %v2750_v51  ;;  %v2757_v58 = vor.u32 %v3039_v53, %v2756_v52  ;;  %v2732_v59 = vld [vmem:[#allocation5 + $0x40] sm:$0xf] }
  0x49   : > { %v3034_v60 = vld [vmem:[#allocation5 + $0x4c] sm:$0xf0]  ;;  %v3032_v61 = vld [vmem:[#allocation5 + $0x44] sm:$0xf]  ;;  %v2761_v62 = vor.u32 %v3037_v54, %v2758_v55  ;;  %v2734_v63 = vld [vmem:[#allocation5 + $0x50] sm:$0xf0] }
  0x4a   : > { %524 = vmatpush.bf16.msra.mxu0 %v2765_v44  ;;  %v2740_v0 = vld [vmem:[#allocation5 + $0x48] sm:$0xf]  ;;  %v3035_v1 = vld [vmem:[#allocation5 + $0x54] sm:$0xf0]  ;;  %v3033_v2 = vld [vmem:[#allocation5 + $0x4c] sm:$0xf]  ;;  %v2733_v4 = vor.u32 %v3034_v60, %v2732_v59  ;;  %v2737_v5 = vor.u32 %v3032_v61, %v2734_v63 }
  0x4b   : > { %573 = vmatpush.bf16.msra.mxu1 %v2769_v45  ;;  %v2742_v3 = vld [vmem:[#allocation5 + $0x58] sm:$0xf0]  ;;  %v2741_v6 = vor.u32 %v3035_v1, %v2740_v0  ;;  %v2716_v7 = vld [vmem:[#allocation5 + $0x20] sm:$0xf]  ;;  %v3030_v8 = vld [vmem:[#allocation5 + $0x2c] sm:$0xf0] }
  0x4c   : > { %622 = vmatpush.bf16.msra.mxu2 %v2773_v46  ;;  %671 = vmatpush.bf16.msra.mxu3 %v2777_v50  ;;  %v3028_v9 = vld [vmem:[#allocation5 + $0x24] sm:$0xf]  ;;  %v2745_v10 = vor.u32 %v3033_v2, %v2742_v3  ;;  %v2718_v11 = vld [vmem:[#allocation5 + $0x30] sm:$0xf0]  ;;  %v2724_v12 = vld [vmem:[#allocation5 + $0x28] sm:$0xf]  ;;  %v2717_v16 = vor.u32 %v3030_v8, %v2716_v7 }
  0x4d   : > { %v3031_v13 = vld [vmem:[#allocation5 + $0x34] sm:$0xf0]  ;;  %v3029_v14 = vld [vmem:[#allocation5 + $0x2c] sm:$0xf]  ;;  %v2726_v15 = vld [vmem:[#allocation5 + $0x38] sm:$0xf0]  ;;  %v2721_v17 = vor.u32 %v3028_v9, %v2718_v11 }
  0x4e   : > { %525 = vmatpush.bf16.msra.mxu0 %v2749_v56  ;;  %v2725_v18 = vor.u32 %v3031_v13, %v2724_v12  ;;  %v2700_v19 = vld [vmem:[#allocation5] sm:$0xf]  ;;  %v3026_v20 = vld [vmem:[#allocation5 + $0xc] sm:$0xf0]  ;;  %v3024_v21 = vld [vmem:[#allocation5 + $0x4] sm:$0xf]  ;;  %v2729_v22 = vor.u32 %v3029_v14, %v2726_v15 }
  0x4f   : > { %574 = vmatpush.bf16.msra.mxu1 %v2753_v57  ;;  %v2702_v23 = vld [vmem:[#allocation5 + $0x10] sm:$0xf0]  ;;  %v2708_v24 = vld [vmem:[#allocation5 + $0x8] sm:$0xf]  ;;  %v3027_v25 = vld [vmem:[#allocation5 + $0x14] sm:$0xf0]  ;;  %v2701_v28 = vor.u32 %v3026_v20, %v2700_v19 }
  0x50   : > { %623 = vmatpush.bf16.msra.mxu2 %v2757_v58  ;;  %672 = vmatpush.bf16.msra.mxu3 %v2761_v62  ;;  %v3025_v26 = vld [vmem:[#allocation5 + $0xc] sm:$0xf]  ;;  %v2710_v27 = vld [vmem:[#allocation5 + $0x18] sm:$0xf0]  ;;  %v295_v29 = vld [vmem:[%s3784_s8] sm:$0xff]  ;;  %v2705_v31 = vor.u32 %v3024_v21, %v2702_v23  ;;  %v2709_v32 = vor.u32 %v3027_v25, %v2708_v24  ;;  %s6035_s16 = scalar_lea.vmem [#allocation10], %s2693_s28 }
  0x51   : > { %v296_v30 = vld [vmem:[%s3784_s8 + $0x8] sm:$0xff]  ;;  %v2713_v33 = vor.u32 %v3025_v26, %v2710_v27  ;;  %v297_v35 = vld [vmem:[%s3784_s8 + $0x10] sm:$0xff]  ;;  %v298_v36 = vld [vmem:[%s3784_s8 + $0x18] sm:$0xff]  ;;  %s3088_s23 = sshll.u32 %s3689_s22, 7  ;;  %s2578_s12 = sshll.u32 %s6035_s16, 4  ;;  %s2579_s12 = int_to_ptr.vmem [resolvable:$true] %s2578_s12 }
  0x52   : > { %526 = vmatpush.bf16.msra.mxu0 %v2733_v4  ;;  %v311_v34 = vpack.c.bf16 %v296_v30, %v295_v29  ;;  %v312_v37 = vpack.c.bf16 %v298_v36, %v297_v35  ;;  %v3079_v38 = vld [vmem:[#allocation8 + $0xb8] sm:$0xff]  ;;  %v300_v43 = vld [vmem:[%s3784_s8 + $0x28] sm:$0xff]  ;;  %v3078_v45 = vld [vmem:[#allocation8 + $0xb0] sm:$0xff]  ;;  %s2577_s11 = scalar_lea.hbm %s6127_s5, %s3088_s23  ;;  %s2566_s22 = scalar_lea.sflag [#allocation4], %s3778_s17 }
  0x53   : > { %575 = vmatpush.bf16.msra.mxu1 %v2737_v5  ;;  %v3063_v39 = vld [vmem:[#allocation8 + $0x38] sm:$0xff]  ;;  %v3062_v46 = vld [vmem:[#allocation8 + $0x30] sm:$0xff]  ;;  %v3077_v52 = vld [vmem:[#allocation8 + $0xa8] sm:$0xff]  ;;  %s2580_s13 = sshll.u32 %s2577_s11, 4  ;;  %s3571_s6 = scalar_lea.hbm %s6127_s5, 512  ;;  %s2581_s13 = int_to_ptr.hbm [resolvable:$true] %s2580_s13 }
  0x54   : > { %624 = vmatpush.bf16.msra.mxu2 %v2741_v6  ;;  %673 = vmatpush.bf16.msra.mxu3 %v2745_v10  ;;  %v3087_v40 = vld [vmem:[#allocation8 + $0xf8] sm:$0xff]  ;;  %v3086_v47 = vld [vmem:[#allocation8 + $0xf0] sm:$0xff]  ;;  %v3061_v53 = vld [vmem:[#allocation8 + $0x28] sm:$0xff]  ;;  %s3565_s14 = sshra.s32 %s2581_s13, 4  ;;  %s3566_s14 = int_to_ptr.hbm [resolvable:$true] %s3565_s14 }
  0x55   : > { %v3071_v41 = vld [vmem:[#allocation8 + $0x78] sm:$0xff]  ;;  %v3070_v48 = vld [vmem:[#allocation8 + $0x70] sm:$0xff]  ;;  %v3085_v54 = vld [vmem:[#allocation8 + $0xe8] sm:$0xff]  ;;  %s3567_s7 = scalar_lea.hbm %s3566_s14, 128  ;;  %p3572_p7 = scmp.lt.s32.totalorder %s3566_s14, %s6127_s5 }
  0x56   : > { %527 = vmatpush.bf16.msra.mxu0 %v2717_v16  ;;  %v299_v42 = vld [vmem:[%s3784_s8 + $0x20] sm:$0xff]  ;;  %v301_v49 = vld [vmem:[%s3784_s8 + $0x30] sm:$0xff]  ;;  %v302_v50 = vld [vmem:[%s3784_s8 + $0x38] sm:$0xff]  ;;  %p3568_p1 = scmp.ne.s32.totalorder %s3566_s14, %s3567_s7  ;;  %p3573_p2 = scmp.lt.s32.totalorder %s3571_s6, %s3567_s7 }
  0x57   : > { %576 = vmatpush.bf16.msra.mxu1 %v2721_v17  ;;  %v313_v44 = vpack.c.bf16 %v300_v43, %v299_v42  ;;  %v314_v51 = vpack.c.bf16 %v302_v50, %v301_v49  ;;  %v3069_v55 = vld [vmem:[#allocation8 + $0x68] sm:$0xff]  ;;  %v303_v56 = vld [vmem:[%s3784_s8 + $0x40] sm:$0xff]  ;;  %v306_v0 = vld [vmem:[%s3784_s8 + $0x58] sm:$0xff] }
  0x58   : > { %625 = vmatpush.bf16.msra.mxu2 %v2725_v18  ;;  %674 = vmatpush.bf16.msra.mxu3 %v2729_v22  ;;  %v304_v57 = vld [vmem:[%s3784_s8 + $0x48] sm:$0xff]  ;;  %v305_v63 = vld [vmem:[%s3784_s8 + $0x50] sm:$0xff]  ;;  %v3075_v2 = vld [vmem:[#allocation8 + $0x98] sm:$0xff]  ;;  %p3569_p4 = pnand %p3568_p1, %p3750_p5  ;;  %p3574_p9 = por %p3573_p2, %p3572_p7 }
  0x59   : > { %v315_v58 = vpack.c.bf16 %v304_v57, %v303_v56  ;;  %v3076_v59 = vld [vmem:[#allocation8 + $0xa0] sm:$0xff]  ;;  %v316_v1 = vpack.c.bf16 %v306_v0, %v305_v63  ;;  %v3059_v3 = vld [vmem:[#allocation8 + $0x18] sm:$0xff]  ;;  %v309_v9 = vld [vmem:[%s3784_s8 + $0x70] sm:$0xff] }
  0x5a   : > { %528 = vmatpush.bf16.msra.mxu0 %v2701_v28  ;;  %v3060_v60 = vld [vmem:[#allocation8 + $0x20] sm:$0xff]  ;;  %v3083_v4 = vld [vmem:[#allocation8 + $0xd8] sm:$0xff]  ;;  %v3074_v19 = vld [vmem:[#allocation8 + $0x90] sm:$0xff]  ;;  %p3570_p8 = pneg %p3569_p4 }
  0x5b   : > { %577 = vmatpush.bf16.msra.mxu1 %v2705_v31  ;;  %v3084_v61 = vld [vmem:[#allocation8 + $0xe0] sm:$0xff]  ;;  %v3067_v5 = vld [vmem:[#allocation8 + $0x58] sm:$0xff]  ;;  %v3058_v20 = vld [vmem:[#allocation8 + $0x10] sm:$0xff] }
  0x5c   : > { %626 = vmatpush.bf16.msra.mxu2 %v2709_v32  ;;  %675 = vmatpush.bf16.msra.mxu3 %v2713_v33  ;;  %v3068_v62 = vld [vmem:[#allocation8 + $0x60] sm:$0xff]  ;;  %v310_v10 = vld [vmem:[%s3784_s8 + $0x78] sm:$0xff]  ;;  %v351_v12 = vld [vmem:[#allocation7] sm:$0xf]  ;;  %p3575_p10 = pnand %p3574_p9, %p3570_p8 }
  0x5d   : > { %529 = vmatmul.bf16.vlgmr.msra.gmra.mxu0 %v311_v34  ;;  %v307_v6 = vld [vmem:[%s3784_s8 + $0x60] sm:$0xff]  ;;  %v308_v7 = vld [vmem:[%s3784_s8 + $0x68] sm:$0xff]  ;;  %v318_v11 = vpack.c.bf16 %v310_v10, %v309_v9  ;;  %v3814_v13 = vperm.slane %v351_v12, 0  ;;  %v3816_v14 = vperm.slane %v351_v12, 1  ;;  %v3082_v21 = vld [vmem:[#allocation8 + $0xd0] sm:$0xff]  ;;  %v3825_v23 = vperm.slane %v351_v12, 2 }
  0x5e   : > { %578 = vmatmul.bf16.vlgmr.msra.gmra.mxu1 %v311_v34  ;;  %2353 = vmatpush.bf16.msrb.mxu0 %v3063_v39  ;;  %v317_v8 = vpack.c.bf16 %v308_v7, %v307_v6  ;;  %v3066_v24 = vld [vmem:[#allocation8 + $0x50] sm:$0xff]  ;;  %v3828_v26 = vperm.slane %v351_v12, 3  ;;  %v3081_v9 = vld [vmem:[#allocation8 + $0xc8] sm:$0xff] }
  0x5f   : > { %627 = vmatmul.bf16.vlgmr.msra.gmra.mxu2 %v311_v34  ;;  %676 = vmatmul.bf16.vlgmr.msra.gmra.mxu3 %v311_v34 }
  0x60   : > { %2451 = vmatpush.bf16.msrb.mxu2 %v3079_v38  ;;  %2500 = vmatpush.bf16.msrb.mxu3 %v3087_v40 }
  0x61   : > { %2402 = vmatpush.bf16.msrb.mxu1 %v3071_v41 }
  0x62   : > { %2354 = vmatpush.bf16.msrb.mxu0 %v3062_v46 }
  0x64   : > { %2452 = vmatpush.bf16.msrb.mxu2 %v3078_v45  ;;  %2501 = vmatpush.bf16.msrb.mxu3 %v3086_v47 }
  0x65   : > { %2403 = vmatpush.bf16.msrb.mxu1 %v3070_v48 }
  0x66   : > { %2355 = vmatpush.bf16.msrb.mxu0 %v3061_v53 }
  0x68   : > { %2453 = vmatpush.bf16.msrb.mxu2 %v3077_v52  ;;  %2502 = vmatpush.bf16.msrb.mxu3 %v3085_v54 }
  0x69   : > { %2404 = vmatpush.bf16.msrb.mxu1 %v3069_v55 }
  0x6a   : > { %2356 = vmatpush.bf16.msrb.mxu0 %v3060_v60 }
  0x6c   : > { %2454 = vmatpush.bf16.msrb.mxu2 %v3076_v59  ;;  %2503 = vmatpush.bf16.msrb.mxu3 %v3084_v61  ;;  %v3057_v61 = vld [vmem:[#allocation8 + $0x8] sm:$0xff] }
  0x6d   : > { %534 = vmatmul.bf16.gmra.mxu0 %v312_v37  ;;  %2405 = vmatpush.bf16.msrb.mxu1 %v3068_v62  ;;  %v3065_v62 = vld [vmem:[#allocation8 + $0x48] sm:$0xff] }
  0x6e   : > { %583 = vmatmul.bf16.gmra.mxu1 %v312_v37  ;;  %2357 = vmatpush.bf16.msrb.mxu0 %v3059_v3 }
  0x6f   : > { %632 = vmatmul.bf16.gmra.mxu2 %v312_v37  ;;  %681 = vmatmul.bf16.gmra.mxu3 %v312_v37 }
  0x70   : > { %2455 = vmatpush.bf16.msrb.mxu2 %v3075_v2  ;;  %2504 = vmatpush.bf16.msrb.mxu3 %v3083_v4 }
  0x71   : > { %2406 = vmatpush.bf16.msrb.mxu1 %v3067_v5 }
  0x72   : > { %2358 = vmatpush.bf16.msrb.mxu0 %v3058_v20 }
  0x74   : > { %2456 = vmatpush.bf16.msrb.mxu2 %v3074_v19  ;;  %2505 = vmatpush.bf16.msrb.mxu3 %v3082_v21 }
  0x75   : > { %2407 = vmatpush.bf16.msrb.mxu1 %v3066_v24 }
  0x76   : > { %2359 = vmatpush.bf16.msrb.mxu0 %v3057_v61 }
  0x78   : > { %2506 = vmatpush.bf16.msrb.mxu3 %v3081_v9  ;;  %v3072_v9 = vld [vmem:[#allocation8 + $0x80] sm:$0xff] }
  0x79   : > { %2408 = vmatpush.bf16.msrb.mxu1 %v3065_v62 }
  0x7d   : > { %539 = vmatmul.bf16.gmra.mxu0 %v313_v44 }
  0x7e   : > { %588 = vmatmul.bf16.gmra.mxu1 %v313_v44 }
  0x7f   : > { %637 = vmatmul.bf16.gmra.mxu2 %v313_v44  ;;  %686 = vmatmul.bf16.gmra.mxu3 %v313_v44 }
  0x8d   : > { %544 = vmatmul.bf16.gmra.mxu0 %v314_v51 }
  0x8e   : > { %593 = vmatmul.bf16.gmra.mxu1 %v314_v51 }
  0x8f   : > { %642 = vmatmul.bf16.gmra.mxu2 %v314_v51  ;;  %691 = vmatmul.bf16.gmra.mxu3 %v314_v51 }
  0x9d   : > { %549 = vmatmul.bf16.gmra.mxu0 %v315_v58 }
  0x9e   : > { %598 = vmatmul.bf16.gmra.mxu1 %v315_v58 }
  0x9f   : > { %647 = vmatmul.bf16.gmra.mxu2 %v315_v58  ;;  %696 = vmatmul.bf16.gmra.mxu3 %v315_v58 }
  0xad   : > { %554 = vmatmul.bf16.gmra.mxu0 %v316_v1 }
  0xae   : > { %603 = vmatmul.bf16.gmra.mxu1 %v316_v1 }
  0xaf   : > { %652 = vmatmul.bf16.gmra.mxu2 %v316_v1  ;;  %701 = vmatmul.bf16.gmra.mxu3 %v316_v1 }
  0xbd   : > { %559 = vmatmul.bf16.gmra.mxu0 %v317_v8 }
  0xbe   : > { %608 = vmatmul.bf16.gmra.mxu1 %v317_v8 }
  0xbf   : > { %657 = vmatmul.bf16.gmra.mxu2 %v317_v8  ;;  %706 = vmatmul.bf16.gmra.mxu3 %v317_v8  ;;  %v3073_v8 = vld [vmem:[#allocation8 + $0x88] sm:$0xff] }
  0xc0   : > { %2457 = vmatpush.bf16.msrb.mxu2 %v3073_v8 }
  0xc4   : > { %2458 = vmatpush.bf16.msrb.mxu2 %v3072_v9 }
  0xcd   : > { %564 = vmatmul.bf16.gmra.mxu0 %v318_v11 }
  0xce   : > { %613 = vmatmul.bf16.gmra.mxu1 %v318_v11 }
  0xcf   : > { %662 = vmatmul.bf16.gmra.mxu2 %v318_v11  ;;  %711 = vmatmul.bf16.gmra.mxu3 %v318_v11 }
  0xda   : > { %v530_v15 = vpop.f32.mrf.mxu0 }
  0xdb   : > { %v3819_v16 = vadd.f32 %v530_v15, %v3814_v13  ;;  %v579_v17 = vpop.f32.mrf.mxu1 }
  0xdc   : > { %v3822_v18 = vadd.f32 %v579_v17, %v3816_v14 }
  0xdd   : > { %v2826_v22 = vmul.f32 -1.702, %v3819_v16 }
  0xde   : > { %v2827_v25 = vmul.f32 -1.702, %v3822_v18 }
  0xdf   : > { %v845_v27 = vmul.f32 1.442695, %v2826_v22 }
  0xe0   : > { %v847_v31 = vmul.f32 1.442695, %v2827_v25 }
  0xe1   : > { %3175 = vpow2.f32 %v845_v27 }
  0xe2   : > { %v628_v28 = vpop.f32.mrf.mxu2  ;;  %v677_v30 = vpop.f32.mrf.mxu3  ;;  %3177 = vpow2.f32 %v847_v31 }
  0xe3   : > { %v3831_v29 = vadd.f32 %v628_v28, %v3825_v23  ;;  %v3834_v32 = vadd.f32 %v677_v30, %v3828_v26  ;;  %v532_v33 = vpop.f32.mrf.mxu0  ;;  %v581_v35 = vpop.f32.mrf.mxu1 }
  0xe4   : > { %v3838_v36 = vadd.f32 %v532_v33, %v3814_v13  ;;  %v3842_v38 = vadd.f32 %v581_v35, %v3816_v14  ;;  %v3056_v35 = vld [vmem:[#allocation8] sm:$0xff] }
  0xe5   : > { %v2828_v34 = vmul.f32 -1.702, %v3831_v29  ;;  %v2829_v37 = vmul.f32 -1.702, %v3834_v32  ;;  %2360 = vmatpush.bf16.msrb.mxu0 %v3056_v35 }
  0xe6   : > { %v2830_v41 = vmul.f32 -1.702, %v3838_v36  ;;  %v2831_v43 = vmul.f32 -1.702, %v3842_v38 }
  0xe7   : > { %v849_v39 = vmul.f32 1.442695, %v2828_v34  ;;  %v3176_v40 = vpop.eup %3175  ;;  %v851_v42 = vmul.f32 1.442695, %v2829_v37  ;;  %v3064_v37 = vld [vmem:[#allocation8 + $0x40] sm:$0xff] }
  0xe8   : > { %v3178_v45 = vpop.eup %3177  ;;  %v3846_v46 = vadd.f32 1.0, %v3176_v40  ;;  %v853_v47 = vmul.f32 1.442695, %v2830_v41  ;;  %v855_v49 = vmul.f32 1.442695, %v2831_v43  ;;  %2409 = vmatpush.bf16.msrb.mxu1 %v3064_v37 }
  0xe9   : > { %3179 = vpow2.f32 %v849_v39  ;;  %v3851_v50 = vadd.f32 1.0, %v3178_v45 }
  0xea   : > { %v630_v44 = vpop.f32.mrf.mxu2  ;;  %3181 = vpow2.f32 %v851_v42  ;;  %v679_v53 = vpop.f32.mrf.mxu3  ;;  %v1046_v21 = vand.u32 2147483647, %v3846_v46  ;;  %v1048_v22 = vand.u32 2147483648, %v3846_v46  ;;  %vm1042_vm0 = vweird.f32 %v3846_v46 }
  0xeb   : > { %v3849_v48 = vadd.f32 %v630_v44, %v3825_v23  ;;  %3183 = vrcp.f32 %v3846_v46  ;;  %v3859_v56 = vadd.f32 %v679_v53, %v3828_v26  ;;  %v535_v7 = vpop.f32.mrf.mxu0  ;;  %v584_v17 = vpop.f32.mrf.mxu1  ;;  %v1061_v25 = vand.u32 2147483647, %v3851_v50 }
  0xec   : > { %3185 = vpow2.f32 %v853_v47  ;;  %v3883_v15 = vadd.f32 %v535_v7, %v3814_v13  ;;  %v3895_v30 = vadd.f32 %v584_v17, %v3816_v14  ;;  %vm1057_vm1 = vweird.f32 %v3851_v50 }
  0xed   : > { %v2832_v52 = vmul.f32 -1.702, %v3849_v48  ;;  %3187 = vpow2.f32 %v855_v49  ;;  %v2833_v0 = vmul.f32 -1.702, %v3859_v56  ;;  %v1049_v44 = vor.u32 1.1754944e-38, %v1048_v22 }
  0xee   : > { %3189 = vrcp.f32 %v3851_v50  ;;  %v2834_v33 = vmul.f32 -1.702, %v3883_v15  ;;  %v1063_v45 = vand.u32 2147483648, %v3851_v50  ;;  %vm3914_vm4 = vcmp.eq.f32.partialorder %v1046_v21, 8.507059e+37 }
  0xef   : > { %v3180_v51 = vpop.eup %3179  ;;  %v857_v57 = vmul.f32 1.442695, %v2832_v52  ;;  %v859_v6 = vmul.f32 1.442695, %v2833_v0  ;;  %vm3918_vm5 = vcmp.eq.f32.partialorder %v1061_v25, 8.507059e+37 }
  0xf0   : > { %v3182_v54 = vpop.eup %3181  ;;  %v3856_v55 = vadd.f32 1.0, %v3180_v51  ;;  %v2835_v53 = vmul.f32 -1.702, %v3895_v30  ;;  %v861_v62 = vmul.f32 1.442695, %v2834_v33 }
  0xf1   : > { %v3861_v58 = vpop.eup %3183  ;;  %v3863_v60 = vadd.f32 1.0, %v3182_v54 }
  0xf2   : > { %v3186_v59 = vpop.eup %3185  ;;  %3191 = vrcp.f32 %v3856_v55  ;;  %v1038_v3 = vmul.f32 %v3861_v58, %v3846_v46  ;;  %v633_v24 = vpop.f32.mrf.mxu2  ;;  %vm1043_vm2 = vweird.f32 %v3861_v58  ;;  %v1078_v61 = vand.u32 2147483648, %v3856_v55 }
  0xf3   : > { %v3188_v63 = vpop.eup %3187  ;;  %3193 = vpow2.f32 %v857_v57  ;;  %v3869_v2 = vadd.f32 1.0, %v3186_v59  ;;  %v682_v34 = vpop.f32.mrf.mxu3  ;;  %v3907_v42 = vadd.f32 %v633_v24, %v3825_v23  ;;  %v1076_v59 = vand.u32 2147483647, %v3856_v55  ;;  %vm3943_vm7 = vmor %vm1042_vm0, %vm1043_vm2 }
  0xf4   : > { %v3867_v1 = vpop.eup %3189  ;;  %3195 = vrcp.f32 %v3863_v60  ;;  %v3874_v4 = vadd.f32 1.0, %v3188_v63  ;;  %v1039_v12 = vsub.f32 1.0, %v1038_v3  ;;  %v3925_v54 = vadd.f32 %v682_v34, %v3828_v26  ;;  %v3972_v37 = vpop.f32.mrf.mxu0 }
  0xf5   : > { %v1053_v5 = vmul.f32 %v3867_v1, %v3851_v50  ;;  %3197 = vrcp.f32 %v3869_v2  ;;  %vm1058_vm3 = vweird.f32 %v3867_v1  ;;  %vm1072_vm6 = vweird.f32 %v3856_v55 }
  0xf6   : > { %3199 = vrcp.f32 %v3874_v4  ;;  %v1040_v31 = vmul.f32 %v3861_v58, %v1039_v12  ;;  %vm1087_vm8 = vweird.f32 %v3863_v60  ;;  %v863_v21 = vmul.f32 1.442695, %v2835_v53  ;;  %vm3958_vm9 = vmor %vm1057_vm1, %vm1058_vm3 }
  0xf7   : > { %v1054_v19 = vsub.f32 1.0, %v1053_v5  ;;  %3201 = vpow2.f32 %v859_v6  ;;  %v2836_v5 = vmul.f32 -1.702, %v3907_v42  ;;  %v1064_v6 = vor.u32 1.1754944e-38, %v1063_v45 }
  0xf8   : > { %v3878_v10 = vpop.eup %3191  ;;  %v1041_v57 = vadd.f32 %v3861_v58, %v1040_v31  ;;  %v2837_v22 = vmul.f32 -1.702, %v3925_v54  ;;  %v1079_v25 = vor.u32 1.1754944e-38, %v1078_v61  ;;  %vm3967_vm10 = vcmp.eq.f32.partialorder %v1076_v59, 8.507059e+37 }
  0xf9   : > { %v3194_v11 = vpop.eup %3193  ;;  %v1068_v27 = vmul.f32 %v3878_v10, %v3856_v55  ;;  %v1055_v40 = vmul.f32 %v3867_v1, %v1054_v19  ;;  %v1091_v19 = vand.u32 2147483647, %v3863_v60  ;;  %vm1073_vm11 = vweird.f32 %v3878_v10 }
  0xfa   : > { %v3885_v20 = vpop.eup %3195  ;;  %v3892_v28 = vadd.f32 1.0, %v3194_v11  ;;  %v3080_v11 = vld [vmem:[#allocation8 + $0xc0] sm:$0xff]  ;;  %v1045_v24 = vsel %vm3943_vm7, %v3861_v58, %v1041_v57  ;;  %v867_v35 = vmul.f32 1.442695, %v2837_v22  ;;  %v3988_v61 = vpop.f32.mrf.mxu2  ;;  %vm3995_vm13 = vmor %vm1072_vm6, %vm1073_vm11  ;;  %vm1102_vm15 = vweird.f32 %v3869_v2 }
  0xfb   : > { %v3900_v39 = vpop.eup %3197  ;;  %v1083_v41 = vmul.f32 %v3885_v20, %v3863_v60  ;;  %v1069_v52 = vsub.f32 1.0, %v1068_v27  ;;  %v1056_v63 = vadd.f32 %v3867_v1, %v1055_v40  ;;  %v865_v27 = vmul.f32 1.442695, %v2836_v5  ;;  %2507 = vmatpush.bf16.msrb.mxu3 %v3080_v11 }
  0xfc   : > { %v3909_v43 = vpop.eup %3199  ;;  %3203 = vrcp.f32 %v3892_v28  ;;  %v1098_v3 = vmul.f32 %v3900_v39, %v3869_v2  ;;  %v1093_v40 = vand.u32 2147483648, %v3863_v60  ;;  %v1050_v53 = vsel %vm3914_vm4, %v1049_v44, %v1045_v24 }
  0xfd   : > { %v3202_v47 = vpop.eup %3201  ;;  %v1084_v0 = vsub.f32 1.0, %v1083_v41  ;;  %v1113_v7 = vmul.f32 %v3909_v43, %v3874_v4  ;;  %v1070_v17 = vmul.f32 %v3878_v10, %v1069_v52  ;;  %3205 = vpow2.f32 %v861_v62 }
  0xfe   : > { %v3937_v8 = vadd.f32 1.0, %v3202_v47  ;;  %v1060_v33 = vsel %vm3958_vm9, %v3867_v1, %v1056_v63  ;;  %v1099_v34 = vsub.f32 1.0, %v1098_v3  ;;  %v1106_v41 = vand.u32 2147483647, %v3869_v2  ;;  %v3977_v47 = vpop.f32.mrf.mxu1 }
  0xff   : > { %v1085_v50 = vmul.f32 %v3885_v20, %v1084_v0  ;;  %v1114_v45 = vsub.f32 1.0, %v1113_v7  ;;  %v1071_v1 = vadd.f32 %v3878_v10, %v1070_v17  ;;  %v1108_v52 = vand.u32 2147483648, %v3869_v2 }
 0x100   : > { %3207 = vrcp.f32 %v3937_v8  ;;  %v1065_v57 = vsel %vm3918_vm5, %v1064_v6, %v1060_v33  ;;  %vm1088_vm12 = vweird.f32 %v3885_v20  ;;  %v1100_v63 = vmul.f32 %v3900_v39, %v1099_v34 }
 0x101   : > { %3209 = vpow2.f32 %v863_v21  ;;  %v1086_v62 = vadd.f32 %v3885_v20, %v1085_v50  ;;  %vm3999_vm14 = vcmp.eq.f32.partialorder %v1091_v19, 8.507059e+37  ;;  %v1094_v51 = vor.u32 1.1754944e-38, %v1093_v40  ;;  %vm4027_vm2 = vmor %vm1087_vm8, %vm1088_vm12  ;;  %v4031_v21 = vpop.f32.mrf.mxu3  ;;  %v540_v40 = vpop.f32.mrf.mxu0 }
 0x102   : > { %v3962_v31 = vpop.eup %3203  ;;  %3211 = vpow2.f32 %v865_v27  ;;  %v1115_v3 = vmul.f32 %v3909_v43, %v1114_v45  ;;  %v1075_v5 = vsel %vm3995_vm13, %v3878_v10, %v1071_v1  ;;  %vm4008_vm0 = vcmp.eq.f32.partialorder %v1106_v41, 8.507059e+37 }
 0x103   : > { %v1128_v59 = vmul.f32 %v3962_v31, %v3892_v28  ;;  %3213 = vpow2.f32 %v867_v35  ;;  %v3206_v0 = vpop.eup %3205  ;;  %vm1117_vm1 = vweird.f32 %v3874_v4  ;;  %v1121_v55 = vand.u32 2147483647, %v3874_v4 }
 0x104   : > { %v1123_v7 = vand.u32 2147483648, %v3874_v4  ;;  %v4018_v11 = vmul.f32 %v1050_v53, %v3819_v16  ;;  %v4021_v12 = vmul.f32 %v1065_v57, %v3822_v18  ;;  %v1109_v17 = vor.u32 1.1754944e-38, %v1108_v52 }
 0x105   : > { %v1129_v19 = vsub.f32 1.0, %v1128_v59  ;;  %v1090_v16 = vsel %vm4027_vm2, %v3885_v20, %v1086_v62  ;;  %v1101_v18 = vadd.f32 %v3900_v39, %v1100_v63  ;;  %vm1103_vm3 = vweird.f32 %v3900_v39 }
 0x106   : > { %v4015_v9 = vpop.eup %3207  ;;  %v4038_v24 = vadd.f32 1.0, %v3206_v0  ;;  %v1080_v46 = vsel %vm3967_vm10, %v1079_v25, %v1075_v5  ;;  %v1116_v27 = vadd.f32 %v3909_v43, %v1115_v3  ;;  %vm1118_vm4 = vweird.f32 %v3909_v43  ;;  %vm4055_vm7 = vmor %vm1102_vm15, %vm1103_vm3  ;;  %v589_v52 = vpop.f32.mrf.mxu1 }
 0x107   : > { %v3210_v22 = vpop.eup %3209  ;;  %v1136_v33 = vand.u32 2147483647, %v3892_v28  ;;  %vm4045_vm5 = vcmp.eq.f32.partialorder %v1121_v55, 8.507059e+37  ;;  %v1124_v20 = vor.u32 1.1754944e-38, %v1123_v7  ;;  %vm1132_vm6 = vweird.f32 %v3892_v28  ;;  %vm4074_vm8 = vmor %vm1117_vm1, %vm1118_vm4  ;;  %v638_v0 = vpop.f32.mrf.mxu2 }
 0x108   : > { %v3212_v60 = vpop.eup %3211  ;;  %v1138_v35 = vand.u32 2147483648, %v3892_v28  ;;  %v1095_v25 = vsel %vm3999_vm14, %v1094_v51, %v1090_v16  ;;  %v1130_v41 = vmul.f32 %v3962_v31, %v1129_v19  ;;  %v1143_v45 = vmul.f32 %v4015_v9, %v3937_v8 }
 0x109   : > { %v3214_v50 = vpop.eup %3213  ;;  %v4062_v1 = vadd.f32 1.0, %v3210_v22  ;;  %v4065_v53 = vmul.f32 %v1080_v46, %v3831_v29  ;;  %v1105_v57 = vsel %vm4055_vm7, %v3900_v39, %v1101_v18  ;;  %3215 = vrcp.f32 %v4038_v24 }
 0x10a   : > { %v4079_v59 = vadd.f32 1.0, %v3212_v60  ;;  %v1120_v29 = vsel %vm4074_vm8, %v3909_v43, %v1116_v27  ;;  %vm4084_vm9 = vcmp.eq.f32.partialorder %v1136_v33, 8.507059e+37  ;;  %v4088_v39 = vadd.f32 1.0, %v3214_v50 }
 0x10b   : > { %v4092_v4 = vadd.f32 %v3972_v37, %v3814_v13  ;;  %v4095_v63 = vadd.f32 %v540_v40, %v3814_v13  ;;  %v4098_v44 = vmul.f32 %v1095_v25, %v3834_v32  ;;  %vm1133_vm10 = vweird.f32 %v3962_v31 }
 0x10c   : > { %v1139_v43 = vor.u32 1.1754944e-38, %v1138_v35  ;;  %v4102_v49 = vadd.f32 %v589_v52, %v3816_v14  ;;  %v1110_v51 = vsel %vm4008_vm0, %v1109_v17, %v1105_v57  ;;  %v1131_v3 = vadd.f32 %v3962_v31, %v1130_v41  ;;  %v687_v17 = vpop.f32.mrf.mxu3  ;;  %vm4126_vm11 = vmor %vm1132_vm6, %vm1133_vm10 }
 0x10d   : > { %v1144_v37 = vsub.f32 1.0, %v1143_v45  ;;  %3217 = vrcp.f32 %v4062_v1  ;;  %v1125_v5 = vsel %vm4045_vm5, %v1124_v20, %v1120_v29  ;;  %v1151_v32 = vand.u32 2147483647, %v3937_v8 }
 0x10e   : > { %3219 = vrcp.f32 %v4079_v59  ;;  %v4113_v55 = vadd.f32 %v638_v0, %v3825_v23  ;;  %v1153_v7 = vand.u32 2147483648, %v3937_v8  ;;  %v2838_v6 = vmul.f32 -1.702, %v4092_v4 }
 0x10f   : > { %3221 = vrcp.f32 %v4088_v39  ;;  %v2842_v10 = vmul.f32 -1.702, %v4095_v63  ;;  %v4119_v19 = vpop.eup %3215  ;;  %v2001_v22 = vmul.f32 %v1110_v51, %v3838_v36  ;;  %vm1147_vm12 = vweird.f32 %v3937_v8 }
 0x110   : > { %v4133_v18 = vadd.f32 %v3977_v47, %v3816_v14  ;;  %v2843_v60 = vmul.f32 -1.702, %v4102_v49  ;;  %v4137_v46 = vmul.f32 %v1125_v5, %v3842_v38  ;;  %v1135_v36 = vsel %vm4126_vm11, %v3962_v31, %v1131_v3 }
 0x111   : > { %v1145_v28 = vmul.f32 %v4015_v9, %v1144_v37  ;;  %v877_v27 = vmul.f32 1.442695, %v2842_v10  ;;  %v1168_v33 = vand.u32 2147483648, %v4038_v24  ;;  %v4146_v50 = vadd.f32 %v3988_v61, %v3825_v23 }
 0x112   : > { %v2844_v47 = vmul.f32 -1.702, %v4113_v55  ;;  %v4150_v34 = vadd.f32 %v687_v17, %v3828_v26  ;;  %vm4154_vm13 = vcmp.eq.f32.partialorder %v1151_v32, 8.507059e+37  ;;  %v1154_v31 = vor.u32 1.1754944e-38, %v1153_v7 }
 0x113   : > { %v4152_v38 = vpop.eup %3217  ;;  %v1158_v35 = vmul.f32 %v4119_v19, %v4038_v24  ;;  %v1166_v40 = vand.u32 2147483647, %v4038_v24  ;;  %v869_v25 = vmul.f32 1.442695, %v2838_v6  ;;  %v1140_v58 = vsel %vm4084_vm9, %v1139_v43, %v1135_v36 }
 0x114   : > { %v4161_v61 = vpop.eup %3219  ;;  %v2839_v41 = vmul.f32 -1.702, %v4133_v18  ;;  %v4168_v45 = vadd.f32 %v4031_v21, %v3828_v26  ;;  %v879_v52 = vmul.f32 1.442695, %v2843_v60  ;;  %v1146_v2 = vadd.f32 %v4015_v9, %v1145_v28 }
 0x115   : > { %v4170_v57 = vpop.eup %3221  ;;  %vm1148_vm14 = vweird.f32 %v4015_v9  ;;  %3223 = vpow2.f32 %v877_v27  ;;  %v2845_v29 = vmul.f32 -1.702, %v4150_v34  ;;  %v4175_v0 = vor.u32 1.1754944e-38, %v1168_v33 }
 0x116   : > { %v1173_v62 = vmul.f32 %v4152_v38, %v4062_v1  ;;  %v2840_v43 = vmul.f32 -1.702, %v4146_v50  ;;  %v881_v51 = vmul.f32 1.442695, %v2844_v47  ;;  %v4181_v21 = vmul.f32 %v1140_v58, %v3849_v48  ;;  %vm4188_vm0 = vmor %vm1147_vm12, %vm1148_vm14  ;;  %v542_v47 = vpop.f32.mrf.mxu0 }
 0x117   : > { %v1159_v3 = vsub.f32 1.0, %v1158_v35  ;;  %vm1162_vm15 = vweird.f32 %v4038_v24  ;;  %v1188_v37 = vmul.f32 %v4161_v61, %v4079_v59  ;;  %3225 = vpow2.f32 %v869_v25 }
 0x118   : > { %v1203_v32 = vmul.f32 %v4170_v57, %v4088_v39  ;;  %v871_v7 = vmul.f32 1.442695, %v2839_v41  ;;  %v2841_v48 = vmul.f32 -1.702, %v4168_v45  ;;  %3227 = vpow2.f32 %v879_v52 }
 0x119   : > { %v1150_v6 = vsel %vm4188_vm0, %v4015_v9, %v1146_v2  ;;  %vm1163_vm1 = vweird.f32 %v4119_v19  ;;  %v883_v10 = vmul.f32 1.442695, %v2845_v29  ;;  %v2061_v8 = vpack.c.bf16 %v2001_v22, %v4018_v11 }
 0x11a   : > { %v1174_v17 = vsub.f32 1.0, %v1173_v62  ;;  %v1183_v16 = vand.u32 2147483648, %v4062_v1  ;;  %v873_v60 = vmul.f32 1.442695, %v2840_v43  ;;  %3229 = vpow2.f32 %v881_v51  ;;  %v591_v62 = vpop.f32.mrf.mxu1  ;;  %vm4243_vm8 = vmor %vm1162_vm15, %vm1163_vm1 }
 0x11b   : > { %v3224_v36 = vpop.eup %3223  ;;  %v1160_v28 = vmul.f32 %v4119_v19, %v1159_v3  ;;  %v1181_v27 = vand.u32 2147483647, %v4062_v1  ;;  %v1189_v33 = vsub.f32 1.0, %v1188_v37  ;;  %2361 = vmatmul.bf16.vlgmr.msrb.gmra.mxu0 %v2061_v8  ;;  %v2062_v9 = vpack.c.bf16 %v4137_v46, %v4021_v12 }
 0x11c   : > { %v1155_v35 = vsel %vm4154_vm13, %v1154_v31, %v1150_v6  ;;  %v1204_v11 = vsub.f32 1.0, %v1203_v32  ;;  %3231 = vpow2.f32 %v871_v7  ;;  %v875_v22 = vmul.f32 1.442695, %v2841_v48 }
 0x11d   : > { %v3226_v25 = vpop.eup %3225  ;;  %vm4207_vm2 = vcmp.eq.f32.partialorder %v1166_v40, 8.507059e+37  ;;  %vm1177_vm3 = vweird.f32 %v4062_v1  ;;  %v1196_v41 = vand.u32 2147483647, %v4079_v59  ;;  %v1198_v52 = vand.u32 2147483648, %v4079_v59  ;;  %2410 = vmatmul.bf16.vlgmr.msrb.gmra.mxu1 %v2062_v9 }
 0x11e   : > { %3233 = vpow2.f32 %v883_v10  ;;  %v3228_v12 = vpop.eup %3227  ;;  %v1175_v46 = vmul.f32 %v4152_v38, %v1174_v17  ;;  %v1184_v20 = vor.u32 1.1754944e-38, %v1183_v16  ;;  %v4215_v31 = vadd.f32 1.0, %v3224_v36 }
 0x11f   : > { %3235 = vpow2.f32 %v873_v60  ;;  %v4218_v40 = vmul.f32 %v1155_v35, %v3859_v56  ;;  %v1161_v2 = vadd.f32 %v4119_v19, %v1160_v28  ;;  %v1190_v29 = vmul.f32 %v4161_v61, %v1189_v33 }
 0x120   : > { %vm1192_vm4 = vweird.f32 %v4079_v59  ;;  %v3230_v43 = vpop.eup %3229  ;;  %vm4223_vm5 = vcmp.eq.f32.partialorder %v1181_v27, 8.507059e+37  ;;  %v1205_v3 = vmul.f32 %v4170_v57, %v1204_v11  ;;  %vm1207_vm6 = vweird.f32 %v4088_v39 }
 0x121   : > { %3237 = vpow2.f32 %v875_v22  ;;  %v4230_v56 = vadd.f32 %v542_v47, %v3814_v13  ;;  %vm4232_vm7 = vcmp.eq.f32.partialorder %v1196_v41, 8.507059e+37  ;;  %v1199_v5 = vor.u32 1.1754944e-38, %v1198_v52  ;;  %v640_v47 = vpop.f32.mrf.mxu2  ;;  %v545_v22 = vpop.f32.mrf.mxu0 }
 0x122   : > { %v1211_v32 = vand.u32 2147483647, %v4088_v39  ;;  %v4237_v7 = vadd.f32 1.0, %v3228_v12  ;;  %v3232_v48 = vpop.eup %3231  ;;  %v1176_v10 = vadd.f32 %v4152_v38, %v1175_v46  ;;  %vm1178_vm9 = vweird.f32 %v4152_v38 }
 0x123   : > { %6179 = vst [vmem:[#allocation15_spill] sm:$0xff] %v4230_v56  ;;  %v1213_v8 = vand.u32 2147483648, %v4088_v39  ;;  %3239 = vrcp.f32 %v4215_v31  ;;  %v1165_v16 = vsel %vm4243_vm8, %v4119_v19, %v1161_v2  ;;  %v1191_v60 = vadd.f32 %v4161_v61, %v1190_v29  ;;  %vm4265_vm12 = vmor %vm1177_vm3, %vm1178_vm9  ;;  %v689_v2 = vpop.f32.mrf.mxu3 }
 0x124   : > { %v3234_v17 = vpop.eup %3233  ;;  %vm1193_vm10 = vweird.f32 %v4161_v61  ;;  %v4256_v24 = vadd.f32 1.0, %v3230_v43  ;;  %v1206_v28 = vadd.f32 %v4170_v57, %v1205_v3  ;;  %vm1208_vm11 = vweird.f32 %v4170_v57  ;;  %v594_v3 = vpop.f32.mrf.mxu1 }
 0x125   : > { %v3236_v36 = vpop.eup %3235  ;;  %v4260_v27 = vadd.f32 1.0, %v3226_v25  ;;  %v2846_v33 = vmul.f32 -1.702, %v4230_v56  ;;  %vm4269_vm13 = vcmp.eq.f32.partialorder %v1211_v32, 8.507059e+37  ;;  %v4273_v35 = vadd.f32 1.0, %v3232_v48  ;;  %vm4289_vm14 = vmor %vm1192_vm4, %vm1193_vm10 }
 0x126   : > { %3241 = vrcp.f32 %v4237_v7  ;;  %v4277_v11 = vadd.f32 %v591_v62, %v3816_v14  ;;  %v1170_v1 = vsel %vm4207_vm2, %v4175_v0, %v1165_v16  ;;  %v1180_v41 = vsel %vm4265_vm12, %v4152_v38, %v1176_v10  ;;  %vm4304_vm15 = vmor %vm1207_vm6, %vm1208_vm11 }
 0x127   : > { %v3238_v25 = vpop.eup %3237  ;;  %v4293_v12 = vadd.f32 1.0, %v3234_v17  ;;  %v2063_v46 = vpack.c.bf16 %v4181_v21, %v4065_v53  ;;  %v1195_v0 = vsel %vm4289_vm14, %v4161_v61, %v1191_v60  ;;  %v1214_v59 = vor.u32 1.1754944e-38, %v1213_v8 }
 0x128   : > { %6188 = vst [vmem:[#allocation16_spill] sm:$0xff] %v4277_v11  ;;  %v4308_v58 = vadd.f32 1.0, %v3236_v36  ;;  %3243 = vrcp.f32 %v4256_v24  ;;  %v1210_v53 = vsel %vm4304_vm15, %v4170_v57, %v1206_v28  ;;  %v885_v61 = vmul.f32 1.442695, %v2846_v33 }
 0x129   : > { %v4311_v29 = vpop.eup %3239  ;;  %3245 = vrcp.f32 %v4260_v27  ;;  %v4318_v39 = vadd.f32 %v545_v22, %v3814_v13  ;;  %2459 = vmatmul.bf16.vlgmr.msrb.gmra.mxu2 %v2063_v46  ;;  %v1185_v21 = vsel %vm4223_vm5, %v1184_v20, %v1180_v41  ;;  %v4323_v62 = vadd.f32 1.0, %v3238_v25  ;;  %v643_v33 = vpop.f32.mrf.mxu2 }
 0x12a   : > { %3247 = vrcp.f32 %v4273_v35  ;;  %v2847_v43 = vmul.f32 -1.702, %v4277_v11  ;;  %v1200_v57 = vsel %vm4232_vm7, %v1199_v5, %v1195_v0  ;;  %v4330_v32 = vadd.f32 %v640_v47, %v3825_v23 }
 0x12b   : > { %3249 = vrcp.f32 %v4293_v12  ;;  %v2064_v48 = vpack.c.bf16 %v4218_v40, %v4098_v44  ;;  %v4337_v20 = vmul.f32 %v1170_v1, %v3883_v15  ;;  %v1215_v6 = vsel %vm4269_vm13, %v1214_v59, %v1210_v53  ;;  %v692_v59 = vpop.f32.mrf.mxu3 }
 0x12c   : > { %6193 = vst [vmem:[#allocation17_spill] sm:$0xff] %v4330_v32  ;;  %v4334_v51 = vpop.eup %3241  ;;  %3251 = vrcp.f32 %v4308_v58  ;;  %v1278_v37 = vmul.f32 %v4311_v29, %v4215_v31  ;;  %v4345_v5 = vmul.f32 %v1185_v21, %v3895_v30  ;;  %v2850_v10 = vmul.f32 -1.702, %v4318_v39 }
 0x12d   : > { %3253 = vpow2.f32 %v885_v61  ;;  %v4349_v44 = vadd.f32 %v594_v3, %v3816_v14  ;;  %2508 = vmatmul.bf16.vlgmr.msrb.gmra.mxu3 %v2064_v48  ;;  %v4354_v40 = vmul.f32 %v1200_v57, %v3907_v42  ;;  %v1288_v8 = vand.u32 2147483648, %v4215_v31 }
 0x12e   : > { %v4351_v15 = vpop.eup %3243  ;;  %v1303_v17 = vand.u32 2147483648, %v4237_v7  ;;  %v887_v16 = vmul.f32 1.442695, %v2847_v43  ;;  %v4361_v30 = vmul.f32 %v1215_v6, %v3925_v54  ;;  %3255 = vrcp.f32 %v4323_v62 }
 0x12f   : > { %v4358_v60 = vpop.eup %3245  ;;  %v1293_v36 = vmul.f32 %v4334_v51, %v4237_v7  ;;  %v2848_v28 = vmul.f32 -1.702, %v4330_v32  ;;  %v1279_v47 = vsub.f32 1.0, %v1278_v37  ;;  %vm1282_vm0 = vweird.f32 %v4215_v31 }
 0x130   : > { %v4367_v42 = vpop.eup %3247  ;;  %v1286_v19 = vand.u32 2147483647, %v4215_v31  ;;  %v4372_v9 = vadd.f32 %v689_v2, %v3828_v26  ;;  %v1301_v22 = vand.u32 2147483647, %v4237_v7  ;;  %v1308_v25 = vmul.f32 %v4351_v15, %v4256_v24 }
 0x131   : > { %v4374_v54 = vpop.eup %3249  ;;  %v893_v1 = vmul.f32 1.442695, %v2850_v10  ;;  %v2851_v41 = vmul.f32 -1.702, %v4349_v44  ;;  %v4382_v46 = vor.u32 1.1754944e-38, %v1288_v8  ;;  %v4384_v0 = vor.u32 1.1754944e-38, %v1303_v17 }
 0x132   : > { %6194 = vst [vmem:[#allocation18_spill] sm:$0xff] %v4372_v9  ;;  %v4380_v52 = vpop.eup %3251  ;;  %3257 = vpow2.f32 %v887_v16  ;;  %v4387_v38 = vadd.f32 %v643_v33, %v3825_v23  ;;  %v1294_v53 = vsub.f32 1.0, %v1293_v36  ;;  %vm1297_vm1 = vweird.f32 %v4237_v7 }
 0x133   : > { %v3254_v2 = vpop.eup %3253  ;;  %v1316_v61 = vand.u32 2147483647, %v4256_v24  ;;  %v1318_v21 = vand.u32 2147483648, %v4256_v24  ;;  %v889_v43 = vmul.f32 1.442695, %v2848_v28  ;;  %v1280_v3 = vmul.f32 %v4311_v29, %v1279_v47  ;;  %v694_v16 = vpop.f32.mrf.mxu3 }
 0x134   : > { %v1323_v57 = vmul.f32 %v4374_v54, %v4293_v12  ;;  %v2849_v48 = vmul.f32 -1.702, %v4372_v9  ;;  %v1218_v6 = vmul.f32 %v4358_v60, %v4260_v27  ;;  %v4398_v37 = vpop.eup %3255  ;;  %v1309_v10 = vsub.f32 1.0, %v1308_v25 }
 0x135   : > { %3259 = vpow2.f32 %v893_v1  ;;  %v895_v8 = vmul.f32 1.442695, %v2851_v41  ;;  %v4401_v17 = vadd.f32 %v692_v59, %v3828_v26  ;;  %vm4403_vm2 = vcmp.eq.f32.partialorder %v1286_v19, 8.507059e+37 }
 0x136   : > { %v1333_v36 = vand.u32 2147483648, %v4293_v12  ;;  %v4408_v28 = vadd.f32 1.0, %v3254_v2  ;;  %v2852_v33 = vmul.f32 -1.702, %v4387_v38  ;;  %v1219_v47 = vsub.f32 1.0, %v1218_v6 }
 0x137   : > { %vm1283_vm3 = vweird.f32 %v4311_v29  ;;  %v1295_v25 = vmul.f32 %v4334_v51, %v1294_v53  ;;  %vm1312_vm4 = vweird.f32 %v4256_v24  ;;  %v4414_v1 = vor.u32 1.1754944e-38, %v1318_v21 }
 0x138   : > { %v1331_v19 = vand.u32 2147483647, %v4293_v12  ;;  %v3258_v41 = vpop.eup %3257  ;;  %v1281_v59 = vadd.f32 %v4311_v29, %v1280_v3  ;;  %v1324_v9 = vsub.f32 1.0, %v1323_v57  ;;  %3261 = vpow2.f32 %v889_v43  ;;  %vm4433_vm7 = vmor %vm1282_vm0, %vm1283_vm3 }
 0x139   : > { %v1220_v2 = vmul.f32 %v4358_v60, %v1219_v47  ;;  %v1310_v32 = vmul.f32 %v4351_v15, %v1309_v10  ;;  %v891_v6 = vmul.f32 1.442695, %v2849_v48  ;;  %3263 = vpow2.f32 %v895_v8 }
 0x13a   : > { %v2853_v11 = vmul.f32 -1.702, %v4401_v17  ;;  %vm1298_vm5 = vweird.f32 %v4334_v51  ;;  %vm4422_vm6 = vcmp.eq.f32.partialorder %v1301_v22, 8.507059e+37  ;;  %v4426_v21 = vor.u32 1.1754944e-38, %v1333_v36 }
 0x13b   : > { %3265 = vrcp.f32 %v4408_v28  ;;  %v897_v3 = vmul.f32 1.442695, %v2852_v33  ;;  %v3260_v43 = vpop.eup %3259  ;;  %v1296_v48 = vadd.f32 %v4334_v51, %v1295_v25  ;;  %vm1313_vm8 = vweird.f32 %v4351_v15  ;;  %v547_v25 = vpop.f32.mrf.mxu0  ;;  %vm4460_vm12 = vmor %vm1297_vm1, %vm1298_vm5 }
 0x13c   : > { %vm4439_vm9 = vcmp.eq.f32.partialorder %v1316_v61, 8.507059e+37  ;;  %vm1327_vm10 = vweird.f32 %v4293_v12  ;;  %v4444_v10 = vadd.f32 1.0, %v3258_v41  ;;  %v1233_v8 = vmul.f32 %v4367_v42, %v4273_v35  ;;  %vm4492_vm1 = vmor %vm1312_vm4, %vm1313_vm8 }
 0x13d   : > { %v1285_v31 = vsel %vm4433_vm7, %v4311_v29, %v1281_v59  ;;  %v1325_v36 = vmul.f32 %v4374_v54, %v1324_v9  ;;  %v1221_v33 = vadd.f32 %v4358_v60, %v1220_v2  ;;  %vm1223_vm11 = vweird.f32 %v4358_v60  ;;  %v596_v59 = vpop.f32.mrf.mxu1 }
 0x13e   : > { %v1311_v61 = vadd.f32 %v4351_v15, %v1310_v32  ;;  %3267 = vpow2.f32 %v891_v6  ;;  %v899_v47 = vmul.f32 1.442695, %v2853_v11  ;;  %v1228_v41 = vand.u32 2147483648, %v4260_v27  ;;  %v3262_v56 = vpop.eup %3261 }
 0x13f   : > { %v4464_v9 = vadd.f32 1.0, %v3260_v43  ;;  %3269 = vpow2.f32 %v897_v3  ;;  %vm1222_vm13 = vweird.f32 %v4260_v27  ;;  %v1226_v11 = vand.u32 2147483647, %v4260_v27  ;;  %v3264_v32 = vpop.eup %3263 }
 0x140   : > { %v1290_v2 = vsel %vm4403_vm2, %v4382_v46, %v1285_v31  ;;  %vm1328_vm14 = vweird.f32 %v4374_v54  ;;  %vm4472_vm15 = vcmp.eq.f32.partialorder %v1331_v19, 8.507059e+37  ;;  %3271 = vrcp.f32 %v4444_v10  ;;  %vm4479_vm0 = vmor %vm1222_vm13, %vm1223_vm11 }
 0x141   : > { %v1234_v27 = vsub.f32 1.0, %v1233_v8  ;;  %v4483_v3 = vpop.eup %3265  ;;  %v1300_v46 = vsel %vm4460_vm12, %v4334_v51, %v1296_v48  ;;  %v1326_v19 = vadd.f32 %v4374_v54, %v1325_v36  ;;  %v4498_v43 = vadd.f32 %v547_v25, %v3814_v13  ;;  %vm4528_vm3 = vmor %vm1327_vm10, %vm1328_vm14 }
 0x142   : > { %v1225_v57 = vsel %vm4479_vm0, %v4358_v60, %v1221_v33  ;;  %v1315_v51 = vsel %vm4492_vm1, %v4351_v15, %v1311_v61  ;;  %3273 = vpow2.f32 %v899_v47  ;;  %v4507_v24 = vadd.f32 %v596_v59, %v3816_v14 }
 0x143   : > { %6211 = vst [vmem:[#allocation19_spill] sm:$0xff] %v4498_v43  ;;  %v1229_v48 = vor.u32 1.1754944e-38, %v1228_v41  ;;  %v4509_v8 = vadd.f32 1.0, %v3262_v56  ;;  %3275 = vrcp.f32 %v4464_v9  ;;  %v4512_v31 = vadd.f32 1.0, %v3264_v32 }
 0x144   : > { %6212 = vst [vmem:[#allocation20_spill] sm:$0xff] %v4507_v24  ;;  %vm1227_vm2 = vcmp.eq.f32.partialorder %v1226_v11, 8.507059e+37  ;;  %v3268_v36 = vpop.eup %3267  ;;  %v4515_v25 = vmul.f32 %v1290_v2, %v4095_v63  ;;  %v1305_v15 = vsel %vm4422_vm6, %v4384_v0, %v1300_v46  ;;  %v1235_v33 = vmul.f32 %v4367_v42, %v1234_v27  ;;  %v645_v46 = vpop.f32.mrf.mxu2 }
 0x145   : > { %v1230_v60 = vsel %vm1227_vm2, %v1229_v48, %v1225_v57  ;;  %v3270_v61 = vpop.eup %3269  ;;  %v1320_v56 = vsel %vm4439_vm9, %v4414_v1, %v1315_v51  ;;  %v2854_v63 = vmul.f32 -1.702, %v4498_v43  ;;  %v1243_v53 = vand.u32 2147483648, %v4273_v35  ;;  %v599_v51 = vpop.f32.mrf.mxu1 }
 0x146   : > { %v2009_v0 = vmul.f32 %v1230_v60, %v4092_v4  ;;  %v4535_v41 = vpop.eup %3271  ;;  %v1330_v1 = vsel %vm4528_vm3, %v4374_v54, %v1326_v19  ;;  %v2855_v22 = vmul.f32 -1.702, %v4507_v24  ;;  %vm1238_vm4 = vweird.f32 %v4367_v42 }
 0x147   : > { %v1241_v12 = vand.u32 2147483647, %v4273_v35  ;;  %v4544_v29 = vmul.f32 %v1305_v15, %v4102_v49  ;;  %v4546_v59 = vadd.f32 1.0, %v3268_v36  ;;  %3277 = vrcp.f32 %v4512_v31 }
 0x148   : > { %v2065_v4 = vpack.c.bf16 %v2009_v0, %v4337_v20  ;;  %v3274_v11 = vpop.eup %3273  ;;  %3279 = vrcp.f32 %v4509_v8  ;;  %v4551_v32 = vadd.f32 1.0, %v3270_v61  ;;  %v1236_v54 = vadd.f32 %v4367_v42, %v1235_v33 }
 0x149   : > { %vm1237_vm5 = vweird.f32 %v4273_v35  ;;  %v4555_v2 = vpop.eup %3275  ;;  %v4558_v49 = vmul.f32 %v1320_v56, %v4113_v55  ;;  %v1335_v6 = vsel %vm4472_vm15, %v4426_v21, %v1330_v1  ;;  %v901_v27 = vmul.f32 1.442695, %v2854_v63  ;;  %v550_v55 = vpop.f32.mrf.mxu0 }
 0x14a   : > { %2366 = vmatmul.bf16.gmra.mxu0 %v2065_v4  ;;  %vm1239_vm6 = vmor %vm1237_vm5, %vm1238_vm4  ;;  %v1244_v20 = vor.u32 1.1754944e-38, %v1243_v53  ;;  %v1408_v19 = vand.u32 2147483648, %v4464_v9  ;;  %v903_v35 = vmul.f32 1.442695, %v2855_v22  ;;  %vm1242_vm7 = vcmp.eq.f32.partialorder %v1241_v12, 8.507059e+37 }
 0x14b   : > { %v1240_v57 = vsel %vm1239_vm6, %v4367_v42, %v1236_v54  ;;  %3281 = vrcp.f32 %v4546_v59  ;;  %v1423_v21 = vand.u32 2147483648, %v4512_v31  ;;  %v4569_v7 = vadd.f32 1.0, %v3274_v11 }
 0x14c   : > { %v1245_v48 = vsel %vm1242_vm7, %v1244_v20, %v1240_v57  ;;  %v4572_v36 = vmul.f32 %v1335_v6, %v4150_v34  ;;  %v1398_v15 = vmul.f32 %v4555_v2, %v4464_v9  ;;  %3283 = vrcp.f32 %v4551_v32 }
 0x14d   : > { %v2010_v42 = vmul.f32 %v1245_v48, %v4133_v18  ;;  %v4578_v60 = vpop.eup %3277  ;;  %3285 = vpow2.f32 %v901_v27  ;;  %v4582_v61 = vadd.f32 %v550_v55, %v3814_v13  ;;  %v4585_v56 = vadd.f32 %v599_v51, %v3816_v14 }
 0x14e   : > { %v4587_v34 = vpop.eup %3279  ;;  %v4589_v47 = vor.u32 1.1754944e-38, %v1408_v19  ;;  %3287 = vpow2.f32 %v903_v35  ;;  %v1248_v18 = vmul.f32 %v4380_v52, %v4308_v58  ;;  %v4595_v53 = vor.u32 1.1754944e-38, %v1423_v21 }
 0x14f   : > { %v2066_v63 = vpack.c.bf16 %v2010_v42, %v4345_v5  ;;  %3289 = vrcp.f32 %v4569_v7  ;;  %v2858_v1 = vmul.f32 -1.702, %v4582_v61  ;;  %v1399_v22 = vsub.f32 1.0, %v1398_v15  ;;  %v648_v42 = vpop.f32.mrf.mxu2 }
 0x150   : > { %v1413_v12 = vmul.f32 %v4578_v60, %v4512_v31  ;;  %v2859_v5 = vmul.f32 -1.702, %v4585_v56  ;;  %v1249_v20 = vsub.f32 1.0, %v1248_v18  ;;  %v4610_v35 = vadd.f32 %v645_v46, %v3825_v23 }
 0x151   : > { %2415 = vmatmul.bf16.gmra.mxu1 %v2066_v63  ;;  %v4603_v11 = vpop.eup %3281  ;;  %v909_v27 = vmul.f32 1.442695, %v2858_v1  ;;  %v1256_v55 = vand.u32 2147483647, %v4308_v58  ;;  %v1258_v51 = vand.u32 2147483648, %v4308_v58  ;;  %vm1253_vm8 = vweird.f32 %v4380_v52 }
 0x152   : > { %v4607_v19 = vpop.eup %3283  ;;  %6215 = vst [vmem:[#allocation21_spill] sm:$0xff] %v4610_v35  ;;  %v911_v57 = vmul.f32 1.442695, %v2859_v5  ;;  %v1250_v48 = vmul.f32 %v4380_v52, %v1249_v20  ;;  %v1263_v15 = vmul.f32 %v4398_v37, %v4323_v62  ;;  %v1400_v46 = vmul.f32 %v4555_v2, %v1399_v22  ;;  %v697_v5 = vpop.f32.mrf.mxu3 }
 0x153   : > { %v4614_v21 = vpop.eup %3285  ;;  %3291 = vpow2.f32 %v909_v27  ;;  %v1414_v18 = vsub.f32 1.0, %v1413_v12  ;;  %v4624_v1 = vadd.f32 %v694_v16, %v3828_v26  ;;  %vm1402_vm9 = vweird.f32 %v4464_v9 }
 0x154   : > { %v4620_v63 = vpop.eup %3287  ;;  %3293 = vpow2.f32 %v911_v57  ;;  %vm1403_vm10 = vweird.f32 %v4555_v2  ;;  %v1428_v27 = vmul.f32 %v4607_v19, %v4551_v32  ;;  %v1251_v20 = vadd.f32 %v4380_v52, %v1250_v48 }
 0x155   : > { %6216 = vst [vmem:[#allocation22_spill] sm:$0xff] %v4624_v1  ;;  %v4626_v6 = vpop.eup %3289  ;;  %vm1252_vm11 = vweird.f32 %v4308_v58  ;;  %v1264_v22 = vsub.f32 1.0, %v1263_v15  ;;  %vm1417_vm12 = vweird.f32 %v4512_v31  ;;  %vm1418_vm13 = vweird.f32 %v4578_v60  ;;  %vm4701_vm7 = vmor %vm1402_vm9, %vm1403_vm10 }
 0x156   : > { %v2856_v16 = vmul.f32 -1.702, %v4610_v35  ;;  %vm1254_vm14 = vmor %vm1252_vm11, %vm1253_vm8  ;;  %vm1257_vm15 = vcmp.eq.f32.partialorder %v1256_v55, 8.507059e+37  ;;  %v1259_v12 = vor.u32 1.1754944e-38, %v1258_v51  ;;  %v4640_v57 = vadd.f32 %v648_v42, %v3825_v23 }
 0x157   : > { %v1255_v54 = vsel %vm1254_vm14, %v4380_v52, %v1251_v20  ;;  %v1265_v48 = vmul.f32 %v4398_v37, %v1264_v22  ;;  %vm1268_vm0 = vweird.f32 %v4398_v37  ;;  %v4646_v58 = vadd.f32 %v697_v5, %v3828_v26  ;;  %vm4713_vm8 = vmor %vm1417_vm12, %vm1418_vm13 }
 0x158   : > { %v1443_v15 = vmul.f32 %v4626_v6, %v4569_v7  ;;  %v2857_v4 = vmul.f32 -1.702, %v4624_v1  ;;  %v1260_v0 = vsel %vm1257_vm15, %v1259_v12, %v1255_v54  ;;  %v1273_v55 = vand.u32 2147483648, %v4323_v62 }
 0x159   : > { %6217 = vst [vmem:[#allocation23_spill] sm:$0xff] %v4646_v58  ;;  %v3292_v51 = vpop.eup %3291  ;;  %v2011_v42 = vmul.f32 %v1260_v0, %v4146_v50  ;;  %v1266_v52 = vadd.f32 %v4398_v37, %v1265_v48  ;;  %vm1267_vm1 = vweird.f32 %v4323_v62  ;;  %v1271_v20 = vand.u32 2147483647, %v4323_v62  ;;  %v552_v0 = vpop.f32.mrf.mxu0 }
 0x15a   : > { %v3294_v22 = vpop.eup %3293  ;;  %v1415_v5 = vmul.f32 %v4578_v60, %v1414_v18  ;;  %v1429_v33 = vsub.f32 1.0, %v1428_v27  ;;  %v4657_v35 = vadd.f32 1.0, %v3292_v51  ;;  %vm4661_vm2 = vmor %vm1267_vm1, %vm1268_vm0  ;;  %v2860_v50 = vmul.f32 -1.702, %v4640_v57 }
 0x15b   : > { %v905_v12 = vmul.f32 1.442695, %v2856_v16  ;;  %v2067_v48 = vpack.c.bf16 %v2011_v42, %v4354_v40  ;;  %v1270_v62 = vsel %vm4661_vm2, %v4398_v37, %v1266_v52  ;;  %v2861_v18 = vmul.f32 -1.702, %v4646_v58  ;;  %v601_v37 = vpop.f32.mrf.mxu1 }
 0x15c   : > { %v6220_v27 = vand.u32 2147483647, %v4464_v9  ;;  %v6223_v1 = vand.u32 2147483647, %v4512_v31  ;;  %v1444_v16 = vsub.f32 1.0, %v1443_v15  ;;  %3295 = vrcp.f32 %v4657_v35 }
 0x15d   : > { %v907_v40 = vmul.f32 1.442695, %v2857_v4  ;;  %v1274_v42 = vor.u32 1.1754944e-38, %v1273_v55  ;;  %v1401_v52 = vadd.f32 %v4555_v2, %v1400_v46  ;;  %vm1432_vm5 = vweird.f32 %v4551_v32  ;;  %2464 = vmatmul.bf16.gmra.mxu2 %v2067_v48 }
 0x15e   : > { %vm4673_vm3 = vcmp.eq.f32.partialorder %v6220_v27, 8.507059e+37  ;;  %vm4679_vm4 = vcmp.eq.f32.partialorder %v6223_v1, 8.507059e+37  ;;  %v4686_v54 = vadd.f32 1.0, %v3294_v22  ;;  %vm1272_vm6 = vcmp.eq.f32.partialorder %v1271_v20, 8.507059e+37 }
 0x15f   : > { %v4689_v27 = vadd.f32 %v552_v0, %v3814_v13  ;;  %v1416_v1 = vadd.f32 %v4578_v60, %v1415_v5  ;;  %v1430_v15 = vmul.f32 %v4607_v19, %v1429_v33  ;;  %v1275_v4 = vsel %vm1272_vm6, %v1274_v42, %v1270_v62 }
 0x160   : > { %v913_v43 = vmul.f32 1.442695, %v2860_v50  ;;  %3297 = vpow2.f32 %v905_v12  ;;  %v2012_v55 = vmul.f32 %v1275_v4, %v4168_v45  ;;  %v915_v58 = vmul.f32 1.442695, %v2861_v18 }
 0x161   : > { %v4695_v46 = vadd.f32 %v601_v37, %v3816_v14  ;;  %v1445_v22 = vmul.f32 %v4626_v6, %v1444_v16  ;;  %v1453_v33 = vand.u32 2147483648, %v4569_v7  ;;  %3299 = vpow2.f32 %v907_v40 }
 0x162   : > { %v1338_v45 = vmul.f32 %v4483_v3, %v4408_v28  ;;  %v4718_v9 = vadd.f32 1.0, %v4614_v21  ;;  %3301 = vrcp.f32 %v4686_v54  ;;  %v2068_v50 = vpack.c.bf16 %v2012_v55, %v4361_v30  ;;  %v4723_v12 = vpop.eup %3295 }
 0x163   : > { %v2862_v0 = vmul.f32 -1.702, %v4689_v27  ;;  %v1405_v48 = vsel %vm4701_vm7, %v4555_v2, %v1401_v52  ;;  %v1420_v31 = vsel %vm4713_vm8, %v4578_v60, %v1416_v1  ;;  %3303 = vpow2.f32 %v913_v43 }
 0x164   : > { %v1339_v62 = vsub.f32 1.0, %v1338_v45  ;;  %v1431_v21 = vadd.f32 %v4607_v19, %v1430_v15  ;;  %vm1433_vm9 = vweird.f32 %v4607_v19  ;;  %2513 = vmatmul.bf16.gmra.mxu3 %v2068_v50  ;;  %3305 = vpow2.f32 %v915_v58 }
 0x165   : > { %v2863_v30 = vmul.f32 -1.702, %v4695_v46  ;;  %v1446_v18 = vadd.f32 %v4626_v6, %v1445_v22  ;;  %vm1447_vm10 = vweird.f32 %v4569_v7  ;;  %vm1448_vm11 = vweird.f32 %v4626_v6  ;;  %vm4750_vm12 = vmor %vm1432_vm5, %vm1433_vm9 }
 0x166   : > { %v4738_v2 = vadd.f32 1.0, %v4620_v63  ;;  %v3298_v60 = vpop.eup %3297  ;;  %v1410_v43 = vsel %vm4673_vm3, %v4589_v47, %v1405_v48  ;;  %v1425_v58 = vsel %vm4679_vm4, %v4595_v53, %v1420_v31  ;;  %v1518_v16 = vmul.f32 %v4723_v12, %v4657_v35  ;;  %vm4778_vm15 = vmor %vm1447_vm10, %vm1448_vm11 }
 0x167   : > { %v917_v40 = vmul.f32 1.442695, %v2862_v0  ;;  %v3300_v42 = vpop.eup %3299  ;;  %v6232_v63 = vand.u32 2147483647, %v4551_v32  ;;  %v6235_v24 = vand.u32 2147483648, %v4551_v32  ;;  %v1340_v1 = vmul.f32 %v4483_v3, %v1339_v62 }
 0x168   : > { %v6236_v53 = vand.u32 2147483647, %v4569_v7  ;;  %v4769_v15 = vpop.eup %3301  ;;  %v1435_v4 = vsel %vm4750_vm12, %v4607_v19, %v1431_v21  ;;  %v1454_v55 = vor.u32 1.1754944e-38, %v1453_v33  ;;  %3307 = vrcp.f32 %v4718_v9 }
 0x169   : > { %vm4756_vm13 = vcmp.eq.f32.partialorder %v6232_v63, 8.507059e+37  ;;  %v1439_v47 = vor.u32 1.1754944e-38, %v6235_v24  ;;  %v919_v20 = vmul.f32 1.442695, %v2863_v30  ;;  %v3304_v22 = vpop.eup %3303  ;;  %v4784_v45 = vmul.f32 %v1410_v43, %v4318_v39 }
 0x16a   : > { %vm4764_vm14 = vcmp.eq.f32.partialorder %v6236_v53, 8.507059e+37  ;;  %v4787_v5 = vmul.f32 %v1425_v58, %v4349_v44  ;;  %v1450_v19 = vsel %vm4778_vm15, %v4626_v6, %v1446_v18  ;;  %3309 = vrcp.f32 %v4738_v2  ;;  %v3306_v7 = vpop.eup %3305 }
 0x16b   : > { %v4793_v50 = vadd.f32 1.0, %v3298_v60  ;;  %v1519_v33 = vsub.f32 1.0, %v1518_v16  ;;  %3311 = vpow2.f32 %v917_v40  ;;  %v1353_v0 = vmul.f32 %v4535_v41, %v4444_v10 }
 0x16c   : > { %v1440_v39 = vsel %vm4756_vm13, %v1439_v47, %v1435_v4  ;;  %v4799_v48 = vadd.f32 1.0, %v3300_v42  ;;  %v1341_v44 = vadd.f32 %v4483_v3, %v1340_v1  ;;  %vm1343_vm0 = vweird.f32 %v4483_v3 }
 0x16d   : > { %v1455_v6 = vsel %vm4764_vm14, %v1454_v55, %v1450_v19  ;;  %v4805_v31 = vadd.f32 1.0, %v3304_v22  ;;  %3313 = vpow2.f32 %v919_v20  ;;  %v1348_v62 = vand.u32 2147483648, %v4408_v28  ;;  %v6243_v55 = vld [vmem:[#allocation15_spill] sm:$0xff] }
 0x16e   : > { %v1533_v21 = vmul.f32 %v4769_v15, %v4686_v54  ;;  %v4810_v30 = vadd.f32 1.0, %v3306_v7  ;;  %vm1342_vm1 = vweird.f32 %v4408_v28  ;;  %v1346_v18 = vand.u32 2147483647, %v4408_v28  ;;  %v4814_v60 = vpop.eup %3307 }
 0x16f   : > { %v4817_v43 = vmul.f32 %v1440_v39, %v4387_v38  ;;  %3315 = vrcp.f32 %v4793_v50  ;;  %v1520_v58 = vmul.f32 %v4723_v12, %v1519_v33  ;;  %vm4821_vm2 = vmor %vm1342_vm1, %vm1343_vm0  ;;  %v1354_v40 = vsub.f32 1.0, %v1353_v0  ;;  %v650_v0 = vpop.f32.mrf.mxu2 }
 0x170   : > { %v4825_v42 = vpop.eup %3309  ;;  %v4828_v37 = vmul.f32 %v1455_v6, %v4401_v17  ;;  %3317 = vrcp.f32 %v4799_v48  ;;  %vm1522_vm3 = vweird.f32 %v4657_v35  ;;  %v1345_v38 = vsel %vm4821_vm2, %v4483_v3, %v1341_v44 }
 0x171   : > { %v3312_v28 = vpop.eup %3311  ;;  %v1526_v63 = vand.u32 2147483647, %v4657_v35  ;;  %v1528_v51 = vand.u32 2147483648, %v4657_v35  ;;  %3319 = vrcp.f32 %v4805_v31  ;;  %v1349_v24 = vor.u32 1.1754944e-38, %v1348_v62 }
 0x172   : > { %v1534_v47 = vsub.f32 1.0, %v1533_v21  ;;  %v1543_v17 = vand.u32 2147483648, %v4686_v54  ;;  %3321 = vrcp.f32 %v4810_v30  ;;  %vm1347_vm4 = vcmp.eq.f32.partialorder %v1346_v18, 8.507059e+37 }
 0x173   : > { %v3314_v53 = vpop.eup %3313  ;;  %v1521_v52 = vadd.f32 %v4723_v12, %v1520_v58  ;;  %vm1523_vm5 = vweird.f32 %v4723_v12  ;;  %vm1537_vm6 = vweird.f32 %v4686_v54  ;;  %v1350_v3 = vsel %vm1347_vm4, %v1349_v24, %v1345_v38 }
 0x174   : > { %v1355_v1 = vmul.f32 %v4535_v41, %v1354_v40  ;;  %v1541_v4 = vand.u32 2147483647, %v4686_v54  ;;  %v4845_v32 = vadd.f32 1.0, %v3312_v28  ;;  %v2017_v20 = vmul.f32 %v1350_v3, %v6243_v55  ;;  %vm4864_vm10 = vmor %vm1522_vm3, %vm1523_vm5 }
 0x175   : > { %vm1358_vm7 = vweird.f32 %v4535_v41  ;;  %v4849_v22 = vpop.eup %3315  ;;  %vm4851_vm8 = vcmp.eq.f32.partialorder %v1526_v63, 8.507059e+37  ;;  %vm1357_vm9 = vweird.f32 %v4444_v10  ;;  %v1361_v33 = vand.u32 2147483647, %v4444_v10  ;;  %v699_v63 = vpop.f32.mrf.mxu3 }
 0x176   : > { %v1356_v7 = vadd.f32 %v4535_v41, %v1355_v1  ;;  %v4858_v39 = vpop.eup %3317  ;;  %v1535_v6 = vmul.f32 %v4769_v15, %v1534_v47  ;;  %v4869_v62 = vadd.f32 1.0, %v3314_v53  ;;  %v2069_v21 = vpack.c.bf16 %v2017_v20, %v4515_v25  ;;  %vm4881_vm12 = vmor %vm1357_vm9, %vm1358_vm7  ;;  %v604_v53 = vpop.f32.mrf.mxu1 }
 0x177   : > { %v1363_v18 = vand.u32 2147483648, %v4444_v10  ;;  %v4873_v58 = vpop.eup %3319  ;;  %v1525_v16 = vsel %vm4864_vm10, %v4723_v12, %v1521_v52  ;;  %v1529_v40 = vor.u32 1.1754944e-38, %v1528_v51  ;;  %vm1538_vm11 = vweird.f32 %v4769_v15 }
 0x178   : > { %v1544_v35 = vor.u32 1.1754944e-38, %v1543_v17  ;;  %v4885_v28 = vpop.eup %3321  ;;  %3323 = vrcp.f32 %v4845_v32  ;;  %2371 = vmatmul.bf16.gmra.mxu0 %v2069_v21  ;;  %v1360_v10 = vsel %vm4881_vm12, %v4535_v41, %v1356_v7  ;;  %v4892_v12 = vadd.f32 %v650_v0, %v3825_v23  ;;  %v555_v17 = vpop.f32.mrf.mxu0  ;;  %vm4932_vm15 = vmor %vm1537_vm6, %vm1538_vm11 }
 0x179   : > { %v1364_v25 = vor.u32 1.1754944e-38, %v1363_v18  ;;  %v1556_v51 = vand.u32 2147483647, %v4805_v31  ;;  %v1558_v24 = vand.u32 2147483648, %v4805_v31  ;;  %v1573_v47 = vand.u32 2147483648, %v4810_v30 }
 0x17a   : > { %vm1362_vm13 = vcmp.eq.f32.partialorder %v1361_v33, 8.507059e+37  ;;  %v1536_v52 = vadd.f32 %v4769_v15, %v1535_v6  ;;  %3325 = vrcp.f32 %v4869_v62  ;;  %v2864_v41 = vmul.f32 -1.702, %v4892_v12  ;;  %v6252_v33 = vld [vmem:[#allocation16_spill] sm:$0xff] }
 0x17b   : > { %v1365_v3 = vsel %vm1362_vm13, %v1364_v25, %v1360_v10  ;;  %v1530_v1 = vsel %vm4851_vm8, %v1529_v40, %v1525_v16  ;;  %vm4902_vm14 = vcmp.eq.f32.partialorder %v1541_v4, 8.507059e+37  ;;  %v1548_v20 = vmul.f32 %v4873_v58, %v4805_v31 }
 0x17c   : > { %v1563_v7 = vmul.f32 %v4885_v28, %v4810_v30  ;;  %v2018_v0 = vmul.f32 %v1365_v3, %v6252_v33  ;;  %v921_v44 = vmul.f32 1.442695, %v2864_v41  ;;  %v4912_v6 = vadd.f32 %v699_v63, %v3828_v26 }
 0x17d   : > { %v4915_v21 = vadd.f32 %v555_v17, %v3814_v13  ;;  %v4918_v4 = vadd.f32 %v604_v53, %v3816_v14  ;;  %v4920_v19 = vor.u32 1.1754944e-38, %v1558_v24  ;;  %v1368_v40 = vmul.f32 %v4587_v34, %v4509_v8 }
 0x17e   : > { %v2070_v16 = vpack.c.bf16 %v2018_v0, %v4544_v29  ;;  %v4926_v38 = vpop.eup %3323  ;;  %v4936_v25 = vor.u32 1.1754944e-38, %v1573_v47  ;;  %3327 = vpow2.f32 %v921_v44  ;;  %v2865_v63 = vmul.f32 -1.702, %v4912_v6 }
 0x17f   : > { %v2866_v29 = vmul.f32 -1.702, %v4915_v21  ;;  %v4941_v24 = vmul.f32 %v1530_v1, %v4582_v61  ;;  %v1540_v17 = vsel %vm4932_vm15, %v4769_v15, %v1536_v52  ;;  %v2867_v54 = vmul.f32 -1.702, %v4918_v4 }
 0x180   : > { %2420 = vmatmul.bf16.gmra.mxu1 %v2070_v16  ;;  %v1369_v53 = vsub.f32 1.0, %v1368_v40  ;;  %v4947_v3 = vpop.eup %3325  ;;  %v1549_v47 = vsub.f32 1.0, %v1548_v20  ;;  %v1564_v41 = vsub.f32 1.0, %v1563_v7  ;;  %v923_v33 = vmul.f32 1.442695, %v2865_v63 }
 0x181   : > { %v925_v0 = vmul.f32 1.442695, %v2866_v29  ;;  %v1578_v44 = vmul.f32 %v4926_v38, %v4845_v32  ;;  %v927_v18 = vmul.f32 1.442695, %v2867_v54  ;;  %vm1373_vm0 = vweird.f32 %v4587_v34 }
 0x182   : > { %v1370_v61 = vmul.f32 %v4587_v34, %v1369_v53  ;;  %3329 = vpow2.f32 %v923_v33  ;;  %v1376_v15 = vand.u32 2147483647, %v4509_v8  ;;  %v1378_v52 = vand.u32 2147483648, %v4509_v8 }
 0x183   : > { %v1383_v1 = vmul.f32 %v4603_v11, %v4546_v59  ;;  %v1593_v20 = vmul.f32 %v4947_v3, %v4869_v62  ;;  %3331 = vpow2.f32 %v925_v0  ;;  %vm1372_vm1 = vweird.f32 %v4509_v8 }
 0x184   : > { %v1371_v7 = vadd.f32 %v4587_v34, %v1370_v61  ;;  %v3328_v16 = vpop.eup %3327  ;;  %v1545_v40 = vsel %vm4902_vm14, %v1544_v35, %v1540_v17  ;;  %3333 = vpow2.f32 %v927_v18  ;;  %vm1374_vm2 = vmor %vm1372_vm1, %vm1373_vm0  ;;  %v1379_v10 = vor.u32 1.1754944e-38, %v1378_v52  ;;  %v6255_v52 = vld [vmem:[#allocation17_spill] sm:$0xff] }
 0x185   : > { %v1384_v63 = vsub.f32 1.0, %v1383_v1  ;;  %vm1552_vm3 = vweird.f32 %v4805_v31  ;;  %v1586_v29 = vand.u32 2147483647, %v4845_v32  ;;  %v4965_v54 = vadd.f32 1.0, %v3328_v16 }
 0x186   : > { %v1375_v53 = vsel %vm1374_vm2, %v4587_v34, %v1371_v7  ;;  %vm1377_vm4 = vcmp.eq.f32.partialorder %v1376_v15, 8.507059e+37  ;;  %v1550_v33 = vmul.f32 %v4873_v58, %v1549_v47  ;;  %vm1567_vm5 = vweird.f32 %v4810_v30 }
 0x187   : > { %v1380_v8 = vsel %vm1377_vm4, %v1379_v10, %v1375_v53  ;;  %v1385_v35 = vmul.f32 %v4603_v11, %v1384_v63  ;;  %vm1388_vm6 = vweird.f32 %v4603_v11  ;;  %v1565_v55 = vmul.f32 %v4885_v28, %v1564_v41 }
 0x188   : > { %v1579_v18 = vsub.f32 1.0, %v1578_v44  ;;  %v1594_v17 = vsub.f32 1.0, %v1593_v20  ;;  %v1393_v0 = vand.u32 2147483648, %v4546_v59  ;;  %v3330_v61 = vpop.eup %3329  ;;  %v2019_v1 = vmul.f32 %v1380_v8, %v6255_v52  ;;  %v653_v20 = vpop.f32.mrf.mxu2 }
 0x189   : > { %v1386_v34 = vadd.f32 %v4603_v11, %v1385_v35  ;;  %vm1387_vm7 = vweird.f32 %v4546_v59  ;;  %v1391_v47 = vand.u32 2147483647, %v4546_v59  ;;  %v3332_v15 = vpop.eup %3331  ;;  %vm1553_vm8 = vweird.f32 %v4873_v58  ;;  %v702_v35 = vpop.f32.mrf.mxu3 }
 0x18a   : > { %vm4981_vm9 = vcmp.eq.f32.partialorder %v1556_v51, 8.507059e+37  ;;  %vm1568_vm10 = vweird.f32 %v4885_v28  ;;  %vm1582_vm11 = vweird.f32 %v4845_v32  ;;  %3335 = vrcp.f32 %v4965_v54  ;;  %vm4992_vm12 = vmor %vm1387_vm7, %vm1388_vm6  ;;  %v3334_v7 = vpop.eup %3333 }
 0x18b   : > { %v4988_v44 = vadd.f32 1.0, %v3330_v61  ;;  %v1551_v51 = vadd.f32 %v4873_v58, %v1550_v33  ;;  %v6260_v16 = vand.u32 2147483647, %v4810_v30  ;;  %v5003_v63 = vadd.f32 1.0, %v3332_v15  ;;  %vm5030_vm15 = vmor %vm1552_vm3, %vm1553_vm8 }
 0x18c   : > { %v2071_v53 = vpack.c.bf16 %v2019_v1, %v4558_v49  ;;  %v1390_v8 = vsel %vm4992_vm12, %v4603_v11, %v1386_v34  ;;  %v1566_v61 = vadd.f32 %v4885_v28, %v1565_v55  ;;  %v1580_v52 = vmul.f32 %v4926_v38, %v1579_v18  ;;  %vm5049_vm2 = vmor %vm1567_vm5, %vm1568_vm10 }
 0x18d   : > { %vm4999_vm13 = vcmp.eq.f32.partialorder %v6260_v16, 8.507059e+37  ;;  %3337 = vrcp.f32 %v4988_v44  ;;  %v1394_v33 = vor.u32 1.1754944e-38, %v1393_v0  ;;  %v1595_v16 = vmul.f32 %v4947_v3, %v1594_v17 }
 0x18e   : > { %3339 = vrcp.f32 %v5003_v63  ;;  %2469 = vmatmul.bf16.gmra.mxu2 %v2071_v53  ;;  %vm1392_vm14 = vcmp.eq.f32.partialorder %v1391_v47, 8.507059e+37  ;;  %v5015_v49 = vadd.f32 %v653_v20, %v3825_v23  ;;  %v1588_v1 = vand.u32 2147483648, %v4845_v32  ;;  %v6269_v20 = vld [vmem:[#allocation18_spill] sm:$0xff] }
 0x18f   : > { %v5018_v11 = vadd.f32 1.0, %v3334_v7  ;;  %v1395_v34 = vsel %vm1392_vm14, %v1394_v33, %v1390_v8  ;;  %v5021_v55 = vadd.f32 %v702_v35, %v3828_v26  ;;  %v5024_v18 = vmul.f32 %v1545_v40, %v4585_v56 }
 0x190   : > { %vm1583_vm0 = vweird.f32 %v4926_v38  ;;  %vm5035_vm1 = vcmp.eq.f32.partialorder %v1586_v29, 8.507059e+37  ;;  %v1601_v47 = vand.u32 2147483647, %v4869_v62  ;;  %v5040_v15 = vpop.eup %3335  ;;  %v1555_v56 = vsel %vm5030_vm15, %v4873_v58, %v1551_v51  ;;  %v557_v29 = vpop.f32.mrf.mxu0 }
 0x191   : > { %v1581_v40 = vadd.f32 %v4926_v38, %v1580_v52  ;;  %vm1598_vm3 = vweird.f32 %v4947_v3  ;;  %3341 = vrcp.f32 %v5018_v11  ;;  %v1570_v59 = vsel %vm5049_vm2, %v4885_v28, %v1566_v61  ;;  %v606_v51 = vpop.f32.mrf.mxu1  ;;  %vm5076_vm5 = vmor %vm1582_vm11, %vm1583_vm0 }
 0x192   : > { %v1596_v58 = vadd.f32 %v4947_v3, %v1595_v16  ;;  %v2020_v7 = vmul.f32 %v1395_v34, %v6269_v20  ;;  %v2868_v30 = vmul.f32 -1.702, %v5015_v49  ;;  %v1589_v8 = vor.u32 1.1754944e-38, %v1588_v1 }
 0x193   : > { %v5062_v53 = vpop.eup %3337  ;;  %vm1597_vm4 = vweird.f32 %v4869_v62  ;;  %v1603_v35 = vand.u32 2147483648, %v4869_v62  ;;  %v2869_v52 = vmul.f32 -1.702, %v5021_v55  ;;  %v1560_v28 = vsel %vm4981_vm9, %v4920_v19, %v1555_v56 }
 0x194   : > { %v5067_v33 = vpop.eup %3339  ;;  %v1608_v16 = vmul.f32 %v5040_v15, %v4965_v54  ;;  %v2072_v62 = vpack.c.bf16 %v2020_v7, %v4572_v36  ;;  %v5084_v1 = vadd.f32 %v557_v29, %v3814_v13  ;;  %v1575_v19 = vsel %vm4999_vm13, %v4936_v25, %v1570_v59  ;;  %vm5094_vm6 = vmor %vm1597_vm4, %vm1598_vm3  ;;  %v6274_v59 = vld [vmem:[#allocation23_spill] sm:$0xff] }
 0x195   : > { %v1585_v32 = vsel %vm5076_vm5, %v4926_v38, %v1581_v40  ;;  %v1623_v36 = vmul.f32 %v5062_v53, %v4988_v44  ;;  %v5101_v34 = vadd.f32 %v606_v51, %v3816_v14  ;;  %v1600_v25 = vsel %vm5094_vm6, %v4947_v3, %v1596_v58 }
 0x196   : > { %vm1602_vm7 = vcmp.eq.f32.partialorder %v1601_v47, 8.507059e+37  ;;  %v1638_v38 = vmul.f32 %v5067_v33, %v5003_v63  ;;  %2518 = vmatmul.bf16.gmra.mxu3 %v2072_v62  ;;  %v929_v10 = vmul.f32 1.442695, %v2868_v30  ;;  %v5111_v56 = vmul.f32 %v1560_v28, %v4640_v57 }
 0x197   : > { %v5108_v17 = vpop.eup %3341  ;;  %v1604_v31 = vor.u32 1.1754944e-38, %v1603_v35  ;;  %v931_v40 = vmul.f32 1.442695, %v2869_v52  ;;  %v1458_v29 = vmul.f32 %v4814_v60, %v4718_v9  ;;  %v5116_v20 = vmul.f32 %v1575_v19, %v6274_v59 }
 0x198   : > { %v1590_v3 = vsel %vm5035_vm1, %v1589_v8, %v1585_v32  ;;  %v1609_v47 = vsub.f32 1.0, %v1608_v16  ;;  %v2870_v58 = vmul.f32 -1.702, %v5084_v1  ;;  %v1624_v30 = vsub.f32 1.0, %v1623_v36 }
 0x199   : > { %v1605_v7 = vsel %vm1602_vm7, %v1604_v31, %v1600_v25  ;;  %v1653_v57 = vmul.f32 %v5108_v17, %v5018_v11  ;;  %v2871_v51 = vmul.f32 -1.702, %v5101_v34  ;;  %v1616_v35 = vand.u32 2147483647, %v4965_v54 }
 0x19a   : > { %v1618_v52 = vand.u32 2147483648, %v4965_v54  ;;  %v1639_v28 = vsub.f32 1.0, %v1638_v38  ;;  %3343 = vpow2.f32 %v929_v10  ;;  %v5127_v61 = vmul.f32 %v1590_v3, %v4689_v27 }
 0x19b   : > { %v1631_v0 = vand.u32 2147483647, %v4988_v44  ;;  %3345 = vpow2.f32 %v931_v40  ;;  %v1459_v8 = vsub.f32 1.0, %v1458_v29  ;;  %v5131_v16 = vmul.f32 %v1605_v7, %v4695_v46 }
 0x19c   : > { %v1610_v62 = vmul.f32 %v5040_v15, %v1609_v47  ;;  %v1633_v19 = vand.u32 2147483648, %v4988_v44  ;;  %v933_v32 = vmul.f32 1.442695, %v2870_v58  ;;  %vm1612_vm8 = vweird.f32 %v4965_v54 }
 0x19d   : > { %v1625_v41 = vmul.f32 %v5062_v53, %v1624_v30  ;;  %v1654_v36 = vsub.f32 1.0, %v1653_v57  ;;  %v935_v25 = vmul.f32 1.442695, %v2871_v51  ;;  %vm5137_vm9 = vcmp.eq.f32.partialorder %v1616_v35, 8.507059e+37  ;;  %v6291_v35 = vld [vmem:[#allocation19_spill] sm:$0xff] }
 0x19e   : > { %v1619_v38 = vor.u32 1.1754944e-38, %v1618_v52  ;;  %vm1627_vm10 = vweird.f32 %v4988_v44  ;;  %v1640_v46 = vmul.f32 %v5067_v33, %v1639_v28  ;;  %vm1642_vm11 = vweird.f32 %v5003_v63 }
 0x19f   : > { %vm5144_vm12 = vcmp.eq.f32.partialorder %v1631_v0, 8.507059e+37  ;;  %v1646_v31 = vand.u32 2147483647, %v5003_v63  ;;  %v1648_v40 = vand.u32 2147483648, %v5003_v63  ;;  %v1460_v29 = vmul.f32 %v4814_v60, %v1459_v8 }
 0x1a0   : > { %v3344_v59 = vpop.eup %3343  ;;  %v1611_v3 = vadd.f32 %v5040_v15, %v1610_v62  ;;  %vm1613_vm13 = vweird.f32 %v5040_v15  ;;  %v1634_v47 = vor.u32 1.1754944e-38, %v1633_v19  ;;  %3347 = vpow2.f32 %v933_v32 }
 0x1a1   : > { %v3346_v58 = vpop.eup %3345  ;;  %v1626_v7 = vadd.f32 %v5062_v53, %v1625_v41  ;;  %vm1628_vm14 = vweird.f32 %v5062_v53  ;;  %v1655_v30 = vmul.f32 %v5108_v17, %v1654_v36  ;;  %3349 = vpow2.f32 %v935_v25  ;;  %vm5162_vm1 = vmor %vm1612_vm8, %vm1613_vm13 }
 0x1a2   : > { %v1641_v57 = vadd.f32 %v5067_v33, %v1640_v46  ;;  %vm1643_vm15 = vweird.f32 %v5067_v33  ;;  %vm1657_vm0 = vweird.f32 %v5018_v11  ;;  %v1661_v51 = vand.u32 2147483647, %v5018_v11  ;;  %vm5176_vm4 = vmor %vm1627_vm10, %vm1628_vm14 }
 0x1a3   : > { %v5166_v52 = vadd.f32 1.0, %v3344_v59  ;;  %v1461_v28 = vadd.f32 %v4814_v60, %v1460_v29  ;;  %vm1462_vm2 = vweird.f32 %v4718_v9  ;;  %vm1463_vm3 = vweird.f32 %v4814_v60  ;;  %vm5190_vm5 = vmor %vm1642_vm11, %vm1643_vm15 }
 0x1a4   : > { %v1615_v0 = vsel %vm5162_vm1, %v5040_v15, %v1611_v3  ;;  %v5180_v8 = vadd.f32 1.0, %v3346_v58  ;;  %v1468_v62 = vand.u32 2147483648, %v4718_v9  ;;  %v1473_v19 = vmul.f32 %v4825_v42, %v4738_v2  ;;  %vm5205_vm8 = vmor %vm1462_vm2, %vm1463_vm3  ;;  %v655_v15 = vpop.f32.mrf.mxu2 }
 0x1a5   : > { %v1630_v32 = vsel %vm5176_vm4, %v5062_v53, %v1626_v7  ;;  %v1656_v44 = vadd.f32 %v5108_v17, %v1655_v30  ;;  %vm1658_vm6 = vweird.f32 %v5108_v17  ;;  %v1466_v41 = vand.u32 2147483647, %v4718_v9 }
 0x1a6   : > { %v3348_v36 = vpop.eup %3347  ;;  %v1645_v25 = vsel %vm5190_vm5, %v5067_v33, %v1641_v57  ;;  %vm1647_vm7 = vcmp.eq.f32.partialorder %v1646_v31, 8.507059e+37  ;;  %v1649_v46 = vor.u32 1.1754944e-38, %v1648_v40  ;;  %v1663_v53 = vand.u32 2147483648, %v5018_v11  ;;  %vm5223_vm11 = vmor %vm1657_vm0, %vm1658_vm6 }
 0x1a7   : > { %v3350_v29 = vpop.eup %3349  ;;  %v1620_v59 = vsel %vm5137_vm9, %v1619_v38, %v1615_v0  ;;  %vm5211_vm10 = vcmp.eq.f32.partialorder %v1661_v51, 8.507059e+37  ;;  %3351 = vrcp.f32 %v5166_v52  ;;  %v1465_v33 = vsel %vm5205_vm8, %v4814_v60, %v1461_v28 }
 0x1a8   : > { %v1635_v9 = vsel %vm5144_vm12, %v1634_v47, %v1630_v32  ;;  %3353 = vrcp.f32 %v5180_v8  ;;  %v1469_v27 = vor.u32 1.1754944e-38, %v1468_v62  ;;  %v1474_v38 = vsub.f32 1.0, %v1473_v19 }
 0x1a9   : > { %v1650_v40 = vsel %vm1647_vm7, %v1649_v46, %v1645_v25  ;;  %v1660_v58 = vsel %vm5223_vm11, %v5108_v17, %v1656_v44  ;;  %v5231_v7 = vadd.f32 1.0, %v3348_v36  ;;  %vm1467_vm9 = vcmp.eq.f32.partialorder %v1466_v41, 8.507059e+37  ;;  %v704_v44 = vpop.f32.mrf.mxu3  ;;  %v560_v36 = vpop.f32.mrf.mxu0 }
 0x1aa   : > { %v5233_v60 = vadd.f32 1.0, %v3350_v29  ;;  %v1470_v10 = vsel %vm1467_vm9, %v1469_v27, %v1465_v33  ;;  %v1475_v11 = vmul.f32 %v4825_v42, %v1474_v38  ;;  %vm1478_vm12 = vweird.f32 %v4825_v42  ;;  %v6294_v27 = vld [vmem:[#allocation20_spill] sm:$0xff] }
 0x1ab   : > { %v5238_v47 = vmul.f32 %v1620_v59, %v4892_v12  ;;  %v1664_v30 = vor.u32 1.1754944e-38, %v1663_v53  ;;  %v1678_v57 = vand.u32 2147483648, %v5166_v52  ;;  %v1483_v51 = vand.u32 2147483648, %v4738_v2 }
 0x1ac   : > { %v2025_v17 = vmul.f32 %v1470_v10, %v6291_v35  ;;  %v1476_v28 = vadd.f32 %v4825_v42, %v1475_v11  ;;  %vm1477_vm13 = vweird.f32 %v4738_v2  ;;  %v1481_v0 = vand.u32 2147483647, %v4738_v2 }
 0x1ad   : > { %v5246_v54 = vpop.eup %3351  ;;  %v5249_v62 = vmul.f32 %v1635_v9, %v4912_v6  ;;  %v5252_v12 = vmul.f32 %v1650_v40, %v4915_v21  ;;  %v1665_v19 = vsel %vm5211_vm10, %v1664_v30, %v1660_v58  ;;  %3355 = vrcp.f32 %v5231_v7  ;;  %vm5257_vm14 = vmor %vm1477_vm13, %vm1478_vm12 }
 0x1ae   : > { %v5261_v2 = vpop.eup %3353  ;;  %v1693_v41 = vand.u32 2147483648, %v5180_v8  ;;  %3357 = vrcp.f32 %v5233_v60  ;;  %v2073_v6 = vpack.c.bf16 %v2025_v17, %v4784_v45  ;;  %v1480_v21 = vsel %vm5257_vm14, %v4825_v42, %v1476_v28  ;;  %v609_v42 = vpop.f32.mrf.mxu1 }
 0x1af   : > { %v1676_v25 = vand.u32 2147483647, %v5166_v52  ;;  %v5270_v46 = vor.u32 1.1754944e-38, %v1678_v57  ;;  %v1691_v53 = vand.u32 2147483647, %v5180_v8  ;;  %v1484_v63 = vor.u32 1.1754944e-38, %v1483_v51 }
 0x1b0   : > { %v5274_v29 = vmul.f32 %v1665_v19, %v4918_v4  ;;  %2376 = vmatmul.bf16.gmra.mxu0 %v2073_v6  ;;  %vm1482_vm15 = vcmp.eq.f32.partialorder %v1481_v0, 8.507059e+37  ;;  %v5277_v59 = vadd.f32 %v655_v15, %v3825_v23  ;;  %v5280_v45 = vadd.f32 %v704_v44, %v3828_v26 }
 0x1b1   : > { %v1668_v3 = vmul.f32 %v5246_v54, %v5166_v52  ;;  %v1683_v33 = vmul.f32 %v5261_v2, %v5180_v8  ;;  %v1485_v9 = vsel %vm1482_vm15, %v1484_v63, %v1480_v21  ;;  %v5287_v31 = vadd.f32 %v560_v36, %v3814_v13 }
 0x1b2   : > { %v5289_v4 = vor.u32 1.1754944e-38, %v1693_v41  ;;  %v2026_v38 = vmul.f32 %v1485_v9, %v6294_v27  ;;  %v2872_v40 = vmul.f32 -1.702, %v5277_v59  ;;  %v2873_v58 = vmul.f32 -1.702, %v5280_v45 }
 0x1b3   : > { %v5294_v10 = vpop.eup %3355  ;;  %v1706_v11 = vand.u32 2147483647, %v5231_v7  ;;  %v2874_v30 = vmul.f32 -1.702, %v5287_v31  ;;  %v5299_v57 = vadd.f32 %v609_v42, %v3816_v14  ;;  %v1488_v51 = vmul.f32 %v4849_v22, %v4793_v50 }
 0x1b4   : > { %v5303_v35 = vpop.eup %3357  ;;  %v1708_v17 = vand.u32 2147483648, %v5231_v7  ;;  %v1723_v28 = vand.u32 2147483648, %v5233_v60  ;;  %v2074_v0 = vpack.c.bf16 %v2026_v38, %v4787_v5  ;;  %v937_v19 = vmul.f32 1.442695, %v2872_v40 }
 0x1b5   : > { %v1669_v32 = vsub.f32 1.0, %v1668_v3  ;;  %v1684_v15 = vsub.f32 1.0, %v1683_v33  ;;  %v939_v44 = vmul.f32 1.442695, %v2873_v58  ;;  %v941_v41 = vmul.f32 1.442695, %v2874_v30 }
 0x1b6   : > { %v1698_v6 = vmul.f32 %v5294_v10, %v5231_v7  ;;  %2425 = vmatmul.bf16.gmra.mxu1 %v2074_v0  ;;  %3359 = vpow2.f32 %v937_v19  ;;  %v2875_v21 = vmul.f32 -1.702, %v5299_v57  ;;  %v1489_v36 = vsub.f32 1.0, %v1488_v51  ;;  %v658_v51 = vpop.f32.mrf.mxu2 }
 0x1b7   : > { %vm1673_vm0 = vweird.f32 %v5246_v54  ;;  %v1713_v63 = vmul.f32 %v5303_v35, %v5233_v60  ;;  %3361 = vpow2.f32 %v939_v44  ;;  %vm1493_vm1 = vweird.f32 %v4849_v22 }
 0x1b8   : > { %v1496_v5 = vand.u32 2147483647, %v4793_v50  ;;  %3363 = vpow2.f32 %v941_v41  ;;  %v943_v42 = vmul.f32 1.442695, %v2875_v21  ;;  %v1490_v3 = vmul.f32 %v4849_v22, %v1489_v36 }
 0x1b9   : > { %v1498_v33 = vand.u32 2147483648, %v4793_v50  ;;  %v1670_v9 = vmul.f32 %v5246_v54, %v1669_v32  ;;  %vm1672_vm2 = vweird.f32 %v5166_v52  ;;  %v5320_v27 = vor.u32 1.1754944e-38, %v1708_v17 }
 0x1ba   : > { %v1721_v38 = vand.u32 2147483647, %v5233_v60  ;;  %v1503_v40 = vmul.f32 %v4858_v39, %v4799_v48  ;;  %vm1687_vm3 = vweird.f32 %v5180_v8  ;;  %v1699_v58 = vsub.f32 1.0, %v1698_v6 }
 0x1bb   : > { %3365 = vpow2.f32 %v943_v42  ;;  %v1491_v30 = vadd.f32 %v4849_v22, %v1490_v3  ;;  %vm1492_vm4 = vweird.f32 %v4793_v50  ;;  %vm1688_vm5 = vweird.f32 %v5261_v2  ;;  %v707_v42 = vpop.f32.mrf.mxu3 }
 0x1bc   : > { %v1714_v0 = vsub.f32 1.0, %v1713_v63  ;;  %vm1494_vm6 = vmor %vm1492_vm4, %vm1493_vm1  ;;  %v1499_v17 = vor.u32 1.1754944e-38, %v1498_v33  ;;  %v1504_v19 = vsub.f32 1.0, %v1503_v40  ;;  %v3360_v32 = vpop.eup %3359  ;;  %v1685_v44 = vmul.f32 %v5261_v2, %v1684_v15  ;;  %v6297_v33 = vld [vmem:[#allocation21_spill] sm:$0xff] }
 0x1bd   : > { %vm1702_vm7 = vweird.f32 %v5231_v7  ;;  %v5333_v41 = vor.u32 1.1754944e-38, %v1723_v28  ;;  %v1495_v6 = vsel %vm1494_vm6, %v4849_v22, %v1491_v30  ;;  %vm1497_vm8 = vcmp.eq.f32.partialorder %v1496_v5, 8.507059e+37  ;;  %v3362_v50 = vpop.eup %3361  ;;  %vm5390_vm4 = vmor %vm1672_vm2, %vm1673_vm0 }
 0x1be   : > { %v1671_v21 = vadd.f32 %v5246_v54, %v1670_v9  ;;  %vm5339_vm10 = vcmp.eq.f32.partialorder %v1676_v25, 8.507059e+37  ;;  %vm1717_vm11 = vweird.f32 %v5233_v60  ;;  %v5344_v63 = vadd.f32 1.0, %v3360_v32  ;;  %v3364_v22 = vpop.eup %3363  ;;  %vm5405_vm0 = vmor %vm1687_vm3, %vm1688_vm5 }
 0x1bf   : > { %v1500_v15 = vsel %vm1497_vm8, %v1499_v17, %v1495_v6  ;;  %v5347_v28 = vadd.f32 %v658_v51, %v3825_v23  ;;  %v1700_v5 = vmul.f32 %v5294_v10, %v1699_v58  ;;  %v5350_v3 = vadd.f32 1.0, %v3362_v50  ;;  %v562_v6 = vpop.f32.mrf.mxu0 }
 0x1c0   : > { %v2027_v9 = vmul.f32 %v1500_v15, %v6297_v33  ;;  %v1505_v25 = vmul.f32 %v4858_v39, %v1504_v19  ;;  %vm5356_vm9 = vcmp.eq.f32.partialorder %v1691_v53, 8.507059e+37  ;;  %vm1703_vm12 = vweird.f32 %v5294_v10  ;;  %v611_v33 = vpop.f32.mrf.mxu1 }
 0x1c1   : > { %v1715_v30 = vmul.f32 %v5303_v35, %v1714_v0  ;;  %vm1718_vm13 = vweird.f32 %v5303_v35  ;;  %3367 = vrcp.f32 %v5344_v63  ;;  %v3366_v58 = vpop.eup %3365  ;;  %v1686_v51 = vadd.f32 %v5261_v2, %v1685_v44  ;;  %vm5432_vm3 = vmor %vm1702_vm7, %vm1703_vm12 }
 0x1c2   : > { %vm5367_vm14 = vcmp.eq.f32.partialorder %v1706_v11, 8.507059e+37  ;;  %3369 = vrcp.f32 %v5350_v3  ;;  %vm1508_vm15 = vweird.f32 %v4858_v39  ;;  %v5374_v53 = vadd.f32 %v707_v42, %v3828_v26  ;;  %vm5454_vm5 = vmor %vm1717_vm11, %vm1718_vm13 }
 0x1c3   : > { %vm5376_vm1 = vcmp.eq.f32.partialorder %v1721_v38, 8.507059e+37  ;;  %v5380_v19 = vadd.f32 1.0, %v3364_v22  ;;  %v5382_v32 = vadd.f32 1.0, %v3366_v58  ;;  %v1513_v11 = vand.u32 2147483648, %v4799_v48 }
 0x1c4   : > { %v2876_v44 = vmul.f32 -1.702, %v5347_v28  ;;  %v1701_v38 = vadd.f32 %v5294_v10, %v1700_v5  ;;  %v2075_v15 = vpack.c.bf16 %v2027_v9, %v4817_v43  ;;  %v1506_v42 = vadd.f32 %v4858_v39, %v1505_v25 }
 0x1c5   : > { %v1511_v22 = vand.u32 2147483647, %v4799_v48  ;;  %v1675_v58 = vsel %vm5390_vm4, %v5246_v54, %v1671_v21  ;;  %v1716_v5 = vadd.f32 %v5303_v35, %v1715_v30  ;;  %3371 = vrcp.f32 %v5380_v19 }
 0x1c6   : > { %vm1507_vm2 = vweird.f32 %v4799_v48  ;;  %v1690_v43 = vsel %vm5405_vm0, %v5261_v2, %v1686_v51  ;;  %3373 = vrcp.f32 %v5382_v32  ;;  %2474 = vmatmul.bf16.gmra.mxu2 %v2075_v15  ;;  %v2877_v54 = vmul.f32 -1.702, %v5374_v53 }
 0x1c7   : > { %vm5418_vm6 = vmor %vm1507_vm2, %vm1508_vm15  ;;  %v5424_v21 = vadd.f32 %v562_v6, %v3814_v13  ;;  %v5426_v9 = vpop.eup %3367  ;;  %v1514_v25 = vor.u32 1.1754944e-38, %v1513_v11  ;;  %v945_v30 = vmul.f32 1.442695, %v2876_v44  ;;  %v5440_v51 = vadd.f32 %v611_v33, %v3816_v14  ;;  %v6314_v44 = vld [vmem:[#allocation22_spill] sm:$0xff] }
 0x1c8   : > { %v1510_v2 = vsel %vm5418_vm6, %v4858_v39, %v1506_v42  ;;  %v5442_v6 = vpop.eup %3369  ;;  %v1680_v50 = vsel %vm5339_vm10, %v5270_v46, %v1675_v58  ;;  %v1705_v7 = vsel %vm5432_vm3, %v5294_v10, %v1701_v38  ;;  %v1728_v11 = vmul.f32 %v5426_v9, %v5344_v63 }
 0x1c9   : > { %vm1512_vm7 = vcmp.eq.f32.partialorder %v1511_v22, 8.507059e+37  ;;  %v1720_v46 = vsel %vm5454_vm5, %v5303_v35, %v1716_v5  ;;  %v1743_v36 = vmul.f32 %v5442_v6, %v5350_v3  ;;  %3375 = vpow2.f32 %v945_v30 }
 0x1ca   : > { %v1515_v10 = vsel %vm1512_vm7, %v1514_v25, %v1510_v2  ;;  %v1695_v60 = vsel %vm5356_vm9, %v5289_v4, %v1690_v43  ;;  %v947_v15 = vmul.f32 1.442695, %v2877_v54  ;;  %v2878_v42 = vmul.f32 -1.702, %v5424_v21  ;;  %v709_v2 = vpop.f32.mrf.mxu3 }
 0x1cb   : > { %v2028_v38 = vmul.f32 %v1515_v10, %v6314_v44  ;;  %v5470_v33 = vpop.eup %3371  ;;  %v1710_v35 = vsel %vm5367_vm14, %v5320_v27, %v1705_v7  ;;  %v2879_v22 = vmul.f32 -1.702, %v5440_v51  ;;  %v2077_v58 = vpack.c.bf16 %v5127_v61, %v4941_v24 }
 0x1cc   : > { %v2078_v40 = vpack.c.bf16 %v5131_v16, %v5024_v18  ;;  %v5480_v4 = vpop.eup %3373  ;;  %v5483_v52 = vmul.f32 %v1680_v50, %v5015_v49  ;;  %v1725_v5 = vsel %vm5376_vm1, %v5333_v41, %v1720_v46  ;;  %v1729_v43 = vsub.f32 1.0, %v1728_v11  ;;  %v660_v18 = vpop.f32.mrf.mxu2 }
 0x1cd   : > { %v2076_v27 = vpack.c.bf16 %v2028_v38, %v4828_v37  ;;  %v1744_v17 = vsub.f32 1.0, %v1743_v36  ;;  %v1758_v8 = vmul.f32 %v5470_v33, %v5380_v19  ;;  %v1773_v24 = vmul.f32 %v5480_v4, %v5382_v32  ;;  %2381 = vmatmul.bf16.gmra.mxu0 %v2077_v58 }
 0x1ce   : > { %3377 = vpow2.f32 %v947_v15  ;;  %2430 = vmatmul.bf16.gmra.mxu1 %v2078_v40  ;;  %v5494_v49 = vmul.f32 %v1695_v60, %v5021_v55  ;;  %v5497_v61 = vmul.f32 %v1710_v35, %v5084_v1  ;;  %v949_v16 = vmul.f32 1.442695, %v2878_v42 }
 0x1cf   : > { %2523 = vmatmul.bf16.gmra.mxu3 %v2076_v27  ;;  %v951_v37 = vmul.f32 1.442695, %v2879_v22  ;;  %v3376_v41 = vpop.eup %3375  ;;  %v5500_v0 = vmul.f32 %v1725_v5, %v5101_v34  ;;  %vm1732_vm8 = vweird.f32 %v5344_v63  ;;  %v1736_v54 = vand.u32 2147483647, %v5344_v63 }
 0x1d0   : > { %v1738_v48 = vand.u32 2147483648, %v5344_v63  ;;  %v1730_v55 = vmul.f32 %v5426_v9, %v1729_v43  ;;  %v5506_v25 = vadd.f32 1.0, %v3376_v41  ;;  %3379 = vpow2.f32 %v949_v16 }
 0x1d1   : > { %v5509_v1 = vadd.f32 %v660_v18, %v3825_v23  ;;  %v1745_v30 = vmul.f32 %v5442_v6, %v1744_v17  ;;  %v1759_v50 = vsub.f32 1.0, %v1758_v8  ;;  %v1774_v34 = vsub.f32 1.0, %v1773_v24 }
 0x1d2   : > { %3381 = vpow2.f32 %v951_v37  ;;  %vm1747_vm10 = vweird.f32 %v5350_v3  ;;  %v1751_v7 = vand.u32 2147483647, %v5350_v3  ;;  %v5516_v39 = vadd.f32 %v709_v2, %v3828_v26 }
 0x1d3   : > { %3383 = vrcp.f32 %v5506_v25  ;;  %vm5518_vm11 = vcmp.eq.f32.partialorder %v1736_v54, 8.507059e+37  ;;  %v1753_v36 = vand.u32 2147483648, %v5350_v3  ;;  %vm1762_vm9 = vweird.f32 %v5380_v19 }
 0x1d4   : > { %v3378_v11 = vpop.eup %3377  ;;  %v1766_v10 = vand.u32 2147483647, %v5380_v19  ;;  %v1731_v60 = vadd.f32 %v5426_v9, %v1730_v55  ;;  %vm1733_vm12 = vweird.f32 %v5426_v9  ;;  %v2880_v38 = vmul.f32 -1.702, %v5509_v1 }
 0x1d5   : > { %v5527_v44 = vadd.f32 1.0, %v3378_v11  ;;  %v1746_v15 = vadd.f32 %v5442_v6, %v1745_v30  ;;  %vm1748_vm13 = vweird.f32 %v5442_v6  ;;  %v1760_v42 = vmul.f32 %v5470_v33, %v1759_v50  ;;  %vm5540_vm15 = vmor %vm1732_vm8, %vm1733_vm12  ;;  %v614_v11 = vpop.f32.mrf.mxu1 }
 0x1d6   : > { %v1775_v35 = vmul.f32 %v5480_v4, %v1774_v34  ;;  %v3380_v22 = vpop.eup %3379  ;;  %v1768_v58 = vand.u32 2147483648, %v5380_v19  ;;  %vm1777_vm14 = vweird.f32 %v5382_v32  ;;  %v2881_v40 = vmul.f32 -1.702, %v5516_v39  ;;  %vm5557_vm0 = vmor %vm1747_vm10, %vm1748_vm13 }
 0x1d7   : > { %3385 = vrcp.f32 %v5527_v44  ;;  %vm1763_vm1 = vweird.f32 %v5470_v33  ;;  %vm1778_vm4 = vweird.f32 %v5480_v4  ;;  %v1781_v27 = vand.u32 2147483647, %v5382_v32 }
 0x1d8   : > { %v3382_v5 = vpop.eup %3381  ;;  %v1783_v17 = vand.u32 2147483648, %v5382_v32  ;;  %v1735_v24 = vsel %vm5540_vm15, %v5426_v9, %v1731_v60  ;;  %v5561_v18 = vadd.f32 1.0, %v3380_v22  ;;  %v953_v37 = vmul.f32 1.442695, %v2880_v38  ;;  %vm5577_vm6 = vmor %vm1762_vm9, %vm1763_vm1  ;;  %v663_v32 = vpop.f32.mrf.mxu2 }
 0x1d9   : > { %v5548_v8 = vpop.eup %3383  ;;  %v5563_v16 = vadd.f32 1.0, %v3382_v5  ;;  %v1750_v41 = vsel %vm5557_vm0, %v5442_v6, %v1746_v15  ;;  %v1761_v54 = vadd.f32 %v5470_v33, %v1760_v42  ;;  %v1776_v9 = vadd.f32 %v5480_v4, %v1775_v35  ;;  %vm5594_vm5 = vmor %vm1777_vm14, %vm1778_vm4 }
 0x1da   : > { %v1788_v3 = vmul.f32 %v5548_v8, %v5506_v25  ;;  %v1739_v2 = vor.u32 1.1754944e-38, %v1738_v48  ;;  %v1754_v55 = vor.u32 1.1754944e-38, %v1753_v36  ;;  %3387 = vrcp.f32 %v5561_v18  ;;  %v565_v48 = vpop.f32.mrf.mxu0 }
 0x1db   : > { %v955_v30 = vmul.f32 1.442695, %v2881_v40  ;;  %vm1752_vm2 = vcmp.eq.f32.partialorder %v1751_v7, 8.507059e+37  ;;  %vm5581_vm3 = vcmp.eq.f32.partialorder %v1766_v10, 8.507059e+37  ;;  %v1769_v34 = vor.u32 1.1754944e-38, %v1768_v58 }
 0x1dc   : > { %3389 = vrcp.f32 %v5563_v16  ;;  %v1740_v7 = vsel %vm5518_vm11, %v1739_v2, %v1735_v24  ;;  %v1755_v60 = vsel %vm1752_vm2, %v1754_v55, %v1750_v41  ;;  %vm5598_vm7 = vcmp.eq.f32.partialorder %v1781_v27, 8.507059e+37 }
 0x1dd   : > { %v5586_v36 = vpop.eup %3385  ;;  %3391 = vpow2.f32 %v953_v37  ;;  %v1765_v38 = vsel %vm5577_vm6, %v5470_v33, %v1761_v54  ;;  %v1780_v46 = vsel %vm5594_vm5, %v5480_v4, %v1776_v9  ;;  %v1784_v15 = vor.u32 1.1754944e-38, %v1783_v17 }
 0x1de   : > { %v1789_v42 = vsub.f32 1.0, %v1788_v3  ;;  %v1803_v35 = vmul.f32 %v5586_v36, %v5527_v44  ;;  %3393 = vpow2.f32 %v955_v30  ;;  %v5611_v22 = vadd.f32 %v565_v48, %v3814_v13 }
 0x1df   : > { %v5614_v58 = vadd.f32 %v614_v11, %v3816_v14  ;;  %v5617_v40 = vmul.f32 %v1740_v7, %v5277_v59  ;;  %v5620_v33 = vmul.f32 %v1755_v60, %v5280_v45  ;;  %v2079_v4 = vpack.c.bf16 %v5238_v47, %v5111_v56 }
 0x1e0   : > { %v2080_v5 = vpack.c.bf16 %v5249_v62, %v5116_v20  ;;  %v5626_v43 = vpop.eup %3387  ;;  %vm1792_vm8 = vweird.f32 %v5506_v25  ;;  %v1796_v27 = vand.u32 2147483647, %v5506_v25  ;;  %v2882_v17 = vmul.f32 -1.702, %v5611_v22 }
 0x1e1   : > { %v2883_v59 = vmul.f32 -1.702, %v5614_v58  ;;  %v5633_v24 = vadd.f32 %v663_v32, %v3825_v23  ;;  %v1770_v56 = vsel %vm5581_vm3, %v1769_v34, %v1765_v38  ;;  %v1785_v20 = vsel %vm5598_vm7, %v1784_v15, %v1780_v46  ;;  %2479 = vmatmul.bf16.gmra.mxu2 %v2079_v4  ;;  %v712_v15 = vpop.f32.mrf.mxu3 }
 0x1e2   : > { %v5635_v45 = vpop.eup %3389  ;;  %v1798_v47 = vand.u32 2147483648, %v5506_v25  ;;  %v1818_v62 = vmul.f32 %v5626_v43, %v5561_v18  ;;  %2528 = vmatmul.bf16.gmra.mxu3 %v2080_v5  ;;  %v1790_v37 = vmul.f32 %v5548_v8, %v1789_v42  ;;  %v1804_v41 = vsub.f32 1.0, %v1803_v35 }
 0x1e3   : > { %v3392_v63 = vpop.eup %3391  ;;  %v1833_v54 = vmul.f32 %v5635_v45, %v5563_v16  ;;  %v957_v9 = vmul.f32 1.442695, %v2882_v17  ;;  %v1811_v3 = vand.u32 2147483647, %v5527_v44  ;;  %v1813_v2 = vand.u32 2147483648, %v5527_v44 }
 0x1e4   : > { %v1819_v55 = vsub.f32 1.0, %v1818_v62  ;;  %v5649_v30 = vadd.f32 1.0, %v3392_v63  ;;  %v3394_v50 = vpop.eup %3393  ;;  %v959_v34 = vmul.f32 1.442695, %v2883_v59  ;;  %v2884_v48 = vmul.f32 -1.702, %v5633_v24 }
 0x1e5   : > { %v1834_v6 = vsub.f32 1.0, %v1833_v54  ;;  %3395 = vpow2.f32 %v957_v9  ;;  %v5653_v11 = vmul.f32 %v1770_v56, %v5287_v31  ;;  %vm5655_vm10 = vcmp.eq.f32.partialorder %v1796_v27, 8.507059e+37 }
 0x1e6   : > { %v1799_v60 = vor.u32 1.1754944e-38, %v1798_v47  ;;  %3397 = vrcp.f32 %v5649_v30  ;;  %v5661_v19 = vmul.f32 %v1785_v20, %v5299_v57  ;;  %v1791_v10 = vadd.f32 %v5548_v8, %v1790_v37  ;;  %v567_v37 = vpop.f32.mrf.mxu0 }
 0x1e7   : > { %vm1793_vm11 = vweird.f32 %v5548_v8  ;;  %v1805_v38 = vmul.f32 %v5586_v36, %v1804_v41  ;;  %vm1807_vm9 = vweird.f32 %v5527_v44  ;;  %v1820_v31 = vmul.f32 %v5626_v43, %v1819_v55 }
 0x1e8   : > { %v5668_v46 = vadd.f32 1.0, %v3394_v50  ;;  %3399 = vpow2.f32 %v959_v34  ;;  %vm5670_vm12 = vcmp.eq.f32.partialorder %v1811_v3, 8.507059e+37  ;;  %v1814_v57 = vor.u32 1.1754944e-38, %v1813_v2  ;;  %vm5678_vm14 = vmor %vm1792_vm8, %vm1793_vm11 }
 0x1e9   : > { %vm1822_vm13 = vweird.f32 %v5561_v18  ;;  %v1835_v32 = vmul.f32 %v5635_v45, %v1834_v6  ;;  %v961_v35 = vmul.f32 1.442695, %v2884_v48  ;;  %vm1808_vm15 = vweird.f32 %v5586_v36 }
 0x1ea   : > { %v1826_v5 = vand.u32 2147483647, %v5561_v18  ;;  %v1828_v27 = vand.u32 2147483648, %v5561_v18  ;;  %3401 = vrcp.f32 %v5668_v46  ;;  %v1795_v59 = vsel %vm5678_vm14, %v5548_v8, %v1791_v10  ;;  %vm5710_vm2 = vmor %vm1807_vm9, %vm1808_vm15 }
 0x1eb   : > { %v3396_v17 = vpop.eup %3395  ;;  %v1806_v56 = vadd.f32 %v5586_v36, %v1805_v38  ;;  %3403 = vpow2.f32 %v961_v35  ;;  %v5691_v25 = vadd.f32 %v712_v15, %v3828_v26  ;;  %v1821_v47 = vadd.f32 %v5626_v43, %v1820_v31 }
 0x1ec   : > { %v5693_v20 = vpop.eup %3397  ;;  %vm1823_vm1 = vweird.f32 %v5626_v43  ;;  %v1841_v62 = vand.u32 2147483647, %v5563_v16  ;;  %v5698_v63 = vadd.f32 1.0, %v3396_v17  ;;  %v1836_v41 = vadd.f32 %v5635_v45, %v1835_v32 }
 0x1ed   : > { %vm1837_vm4 = vweird.f32 %v5563_v16  ;;  %vm1838_vm0 = vweird.f32 %v5635_v45  ;;  %v1843_v8 = vand.u32 2147483648, %v5563_v16  ;;  %v1800_v9 = vsel %vm5655_vm10, %v1799_v60, %v1795_v59  ;;  %vm5728_vm3 = vmor %vm1822_vm13, %vm1823_vm1 }
 0x1ee   : > { %v3400_v54 = vpop.eup %3399  ;;  %vm5714_vm6 = vcmp.eq.f32.partialorder %v1826_v5, 8.507059e+37  ;;  %v1848_v55 = vmul.f32 %v5693_v20, %v5649_v30  ;;  %3405 = vrcp.f32 %v5698_v63  ;;  %v1810_v50 = vsel %vm5710_vm2, %v5586_v36, %v1806_v56  ;;  %vm5747_vm5 = vmor %vm1837_vm4, %vm1838_vm0 }
 0x1ef   : > { %v5732_v6 = vadd.f32 1.0, %v3400_v54  ;;  %v2885_v34 = vmul.f32 -1.702, %v5691_v25  ;;  %v5736_v48 = vadd.f32 %v567_v37, %v3814_v13  ;;  %v1825_v36 = vsel %vm5728_vm3, %v5626_v43, %v1821_v47 }
 0x1f0   : > { %v5738_v7 = vpop.eup %3401  ;;  %v1829_v60 = vor.u32 1.1754944e-38, %v1828_v27  ;;  %vm5751_vm7 = vcmp.eq.f32.partialorder %v1841_v62, 8.507059e+37  ;;  %v2081_v13 = vpack.c.bf16 %v5497_v61, %v5252_v12  ;;  %v1840_v43 = vsel %vm5747_vm5, %v5635_v45, %v1836_v41  ;;  %v616_v12 = vpop.f32.mrf.mxu1 }
 0x1f1   : > { %v3404_v38 = vpop.eup %3403  ;;  %v1844_v31 = vor.u32 1.1754944e-38, %v1843_v8  ;;  %v1858_v15 = vand.u32 2147483648, %v5649_v30  ;;  %3407 = vrcp.f32 %v5732_v6  ;;  %v5763_v16 = vmul.f32 %v1800_v9, %v5347_v28 }
 0x1f2   : > { %v1815_v32 = vsel %vm5670_vm12, %v1814_v57, %v1810_v50  ;;  %v1849_v35 = vsub.f32 1.0, %v1848_v55  ;;  %v5767_v4 = vadd.f32 1.0, %v3404_v38  ;;  %2386 = vmatmul.bf16.gmra.mxu0 %v2081_v13  ;;  %v1830_v61 = vsel %vm5714_vm6, %v1829_v60, %v1825_v36  ;;  %v665_v55 = vpop.f32.mrf.mxu2  ;;  %v714_v38 = vpop.f32.mrf.mxu3 }
 0x1f3   : > { %v1863_v45 = vmul.f32 %v5738_v7, %v5668_v46  ;;  %v963_v5 = vmul.f32 1.442695, %v2885_v34  ;;  %v2886_v27 = vmul.f32 -1.702, %v5736_v48  ;;  %v1845_v28 = vsel %vm5751_vm7, %v1844_v31, %v1840_v43 }
 0x1f4   : > { %v5774_v17 = vpop.eup %3405  ;;  %vm1852_vm8 = vweird.f32 %v5649_v30  ;;  %v1856_v42 = vand.u32 2147483647, %v5649_v30  ;;  %v1873_v57 = vand.u32 2147483648, %v5668_v46  ;;  %3409 = vrcp.f32 %v5767_v4 }
 0x1f5   : > { %v5783_v59 = vmul.f32 %v1815_v32, %v5374_v53  ;;  %v5785_v56 = vor.u32 1.1754944e-38, %v1858_v15  ;;  %v1878_v47 = vmul.f32 %v5774_v17, %v5698_v63  ;;  %v5790_v62 = vadd.f32 %v616_v12, %v3816_v14 }
 0x1f6   : > { %v5793_v37 = vmul.f32 %v1830_v61, %v5424_v21  ;;  %v1850_v41 = vmul.f32 %v5693_v20, %v1849_v35  ;;  %v1871_v8 = vand.u32 2147483647, %v5668_v46  ;;  %3411 = vpow2.f32 %v963_v5 }
 0x1f7   : > { %v5797_v54 = vpop.eup %3407  ;;  %v5800_v53 = vmul.f32 %v1845_v28, %v5440_v51  ;;  %v1864_v9 = vsub.f32 1.0, %v1863_v45  ;;  %v1879_v3 = vsub.f32 1.0, %v1878_v47  ;;  %v965_v2 = vmul.f32 1.442695, %v2886_v27 }
 0x1f8   : > { %vm1853_vm10 = vweird.f32 %v5693_v20  ;;  %vm1867_vm11 = vweird.f32 %v5668_v46  ;;  %v5804_v14 = vor.u32 1.1754944e-38, %v1873_v57  ;;  %vm1882_vm9 = vweird.f32 %v5698_v63 }
 0x1f9   : > { %v1893_v21 = vmul.f32 %v5797_v54, %v5732_v6  ;;  %vm5809_vm12 = vcmp.eq.f32.partialorder %v1856_v42, 8.507059e+37  ;;  %v1886_v51 = vand.u32 2147483647, %v5698_v63  ;;  %v1888_v44 = vand.u32 2147483648, %v5698_v63  ;;  %vm5836_vm14 = vmor %vm1852_vm8, %vm1853_vm10 }
 0x1fa   : > { %3413 = vpow2.f32 %v965_v2  ;;  %v2887_v34 = vmul.f32 -1.702, %v5790_v62  ;;  %v5816_v36 = vpop.eup %3409  ;;  %v1851_v60 = vadd.f32 %v5693_v20, %v1850_v41  ;;  %v2082_v10 = vpack.c.bf16 %v5500_v0, %v5274_v29 }
 0x1fb   : > { %v1894_v18 = vsub.f32 1.0, %v1893_v21  ;;  %v5822_v13 = vadd.f32 %v665_v55, %v3825_v23  ;;  %v1865_v43 = vmul.f32 %v5738_v7, %v1864_v9  ;;  %vm1868_vm13 = vweird.f32 %v5738_v7 }
 0x1fc   : > { %v1880_v31 = vmul.f32 %v5774_v17, %v1879_v3  ;;  %v1908_v15 = vmul.f32 %v5816_v36, %v5767_v4  ;;  %v3412_v32 = vpop.eup %3411  ;;  %v1901_v12 = vand.u32 2147483647, %v5732_v6  ;;  %v967_v61 = vmul.f32 1.442695, %v2887_v34  ;;  %2435 = vmatmul.bf16.gmra.mxu1 %v2082_v10  ;;  %vm5872_vm6 = vmor %vm1867_vm11, %vm1868_vm13 }
 0x1fd   : > { %v1895_v35 = vmul.f32 %v5797_v54, %v1894_v18  ;;  %v2888_v23 = vmul.f32 -1.702, %v5822_v13  ;;  %vm5840_vm15 = vcmp.eq.f32.partialorder %v1871_v8, 8.507059e+37  ;;  %vm5844_vm1 = vcmp.eq.f32.partialorder %v1886_v51, 8.507059e+37 }
 0x1fe   : > { %v1909_v5 = vsub.f32 1.0, %v1908_v15  ;;  %v5848_v27 = vadd.f32 1.0, %v3412_v32  ;;  %v5851_v28 = vadd.f32 %v714_v38, %v3828_v26  ;;  %v2083_v30 = vpack.c.bf16 %v5617_v40, %v5483_v52 }
 0x1ff   : > { %v1855_v42 = vsel %vm5836_vm14, %v5693_v20, %v1851_v60  ;;  %v1903_v57 = vand.u32 2147483648, %v5732_v6  ;;  %3415 = vpow2.f32 %v967_v61  ;;  %v969_v47 = vmul.f32 1.442695, %v2888_v23 }
 0x200   : > { %v3414_v41 = vpop.eup %3413  ;;  %v1866_v8 = vadd.f32 %v5738_v7, %v1865_v43  ;;  %v1881_v9 = vadd.f32 %v5774_v17, %v1880_v31  ;;  %vm1883_vm4 = vweird.f32 %v5774_v17  ;;  %3417 = vrcp.f32 %v5848_v27  ;;  %2484 = vmatmul.bf16.gmra.mxu2 %v2083_v30 }
 0x201   : > { %v1896_v26 = vadd.f32 %v5797_v54, %v1895_v35  ;;  %vm1897_vm0 = vweird.f32 %v5732_v6  ;;  %vm1898_vm2 = vweird.f32 %v5797_v54  ;;  %v5866_v52 = vadd.f32 1.0, %v3414_v41  ;;  %vm5883_vm3 = vmor %vm1882_vm9, %vm1883_vm4  ;;  %v5935_v35 = vpop.f32.mrf.mxu3 }
 0x202   : > { %v1889_v20 = vor.u32 1.1754944e-38, %v1888_v44  ;;  %v1910_v3 = vmul.f32 %v5816_v36, %v1909_v5  ;;  %3419 = vpow2.f32 %v969_v47  ;;  %v2889_v2 = vmul.f32 -1.702, %v5851_v28  ;;  %vm5900_vm7 = vmor %vm1897_vm0, %vm1898_vm2 }
 0x203   : > { %v1860_v55 = vsel %vm5809_vm12, %v5785_v56, %v1855_v42  ;;  %vm5887_vm5 = vcmp.eq.f32.partialorder %v1901_v12, 8.507059e+37  ;;  %v1904_v51 = vor.u32 1.1754944e-38, %v1903_v57  ;;  %3421 = vrcp.f32 %v5866_v52  ;;  %v5965_v57 = vld [vmem:[%s6126_s4] ss:$0 sm:$0xff] }
 0x204   : > { %v1870_v44 = vsel %vm5872_vm6, %v5738_v7, %v1866_v8  ;;  %v1885_v56 = vsel %vm5883_vm3, %v5774_v17, %v1881_v9  ;;  %v1916_v50 = vand.u32 2147483647, %v5767_v4  ;;  %v1918_v34 = vand.u32 2147483648, %v5767_v4 }
 0x205   : > { %v3416_v60 = vpop.eup %3415  ;;  %v1900_v18 = vsel %vm5900_vm7, %v5797_v54, %v1896_v26  ;;  %v971_v7 = vmul.f32 1.442695, %v2889_v2  ;;  %v2084_v10 = vpack.c.bf16 %v5620_v33, %v5494_v49  ;;  %v2085_v6 = vpack.c.bf16 %v5793_v37, %v5653_v11  ;;  %v2362_v33 = vpop.f32.mrf.mxu0 }
 0x206   : > { %v5913_v17 = vpop.eup %3417  ;;  %v1911_v38 = vadd.f32 %v5816_v36, %v1910_v3  ;;  %vm1912_vm8 = vweird.f32 %v5767_v4  ;;  %vm1913_vm10 = vweird.f32 %v5816_v36  ;;  %v5918_v43 = vadd.f32 1.0, %v3416_v60  ;;  %v2411_v11 = vpop.f32.mrf.mxu1 }
 0x207   : > { %v2051_v31 = vmul.f32 %v1860_v55, %v5509_v1  ;;  %v1875_v54 = vsel %vm5840_vm15, %v5804_v14, %v1870_v44  ;;  %v1890_v49 = vsel %vm5844_vm1, %v1889_v20, %v1885_v56  ;;  %3423 = vpow2.f32 %v971_v7  ;;  %2533 = vmatmul.bf16.gmra.mxu3 %v2084_v10  ;;  %2391 = vmatmul.bf16.gmra.mxu0 %v2085_v6  ;;  %v5933_v14 = vpop.f32.mrf.mxu2  ;;  %vm5941_vm9 = vmor %vm1912_vm8, %vm1913_vm10 }
 0x208   : > { %v3420_v37 = vpop.eup %3419  ;;  %v1905_v15 = vsel %vm5887_vm5, %v1904_v51, %v1900_v18  ;;  %vm5928_vm11 = vcmp.eq.f32.partialorder %v1916_v50, 8.507059e+37  ;;  %v1919_v1 = vor.u32 1.1754944e-38, %v1918_v34  ;;  %3425 = vrcp.f32 %v5918_v43 }
 0x209   : > { %v3422_v12 = vpop.eup %3421  ;;  %v1923_v23 = vmul.f32 %v5913_v17, %v5848_v27  ;;  %v1946_v29 = vand.u32 2147483647, %v5866_v52  ;;  %v5948_v0 = vadd.f32 1.0, %v3420_v37  ;;  %v2086_v45 = vpack.c.bf16 %v5800_v53, %v5661_v19  ;;  %v2511_v50 = vpop.f32.mrf.mxu3 }
 0x20a   : > { %v5953_v5 = vmul.f32 %v1875_v54, %v5516_v39  ;;  %v5956_v30 = vmul.f32 %v1890_v49, %v5611_v22  ;;  %v1915_v4 = vsel %vm5941_vm9, %v5816_v36, %v1911_v38  ;;  %v1938_v42 = vmul.f32 %v3422_v12, %v5866_v52 }
 0x20b   : > { %v1931_v47 = vand.u32 2147483647, %v5848_v27  ;;  %v1933_v19 = vand.u32 2147483648, %v5848_v27  ;;  %v1948_v39 = vand.u32 2147483648, %v5866_v52  ;;  %3427 = vrcp.f32 %v5948_v0 }
 0x20c   : > { %v5972_v22 = vmul.f32 %v1905_v15, %v5614_v58  ;;  %v1939_v53 = vsub.f32 1.0, %v1938_v42  ;;  %vm1942_vm12 = vweird.f32 %v5866_v52  ;;  %v2087_v36 = vpack.c.bf16 %v2051_v31, %v5763_v16  ;;  %2440 = vmatmul.bf16.gmra.mxu1 %v2086_v45 }
 0x20d   : > { %v3424_v41 = vpop.eup %3423  ;;  %v5978_v8 = vsel %vm5928_vm11, %v1919_v1, %v1915_v4  ;;  %v1924_v9 = vsub.f32 1.0, %v1923_v23  ;;  %vm5980_vm13 = vcmp.eq.f32.partialorder %v1946_v29, 8.507059e+37  ;;  %v1961_v40 = vand.u32 2147483647, %v5918_v43  ;;  %v2364_v21 = vpop.f32.mrf.mxu0 }
 0x20e   : > { %v3426_v58 = vpop.eup %3425  ;;  %v1940_v20 = vmul.f32 %v3422_v12, %v1939_v53  ;;  %vm1943_vm14 = vweird.f32 %v3422_v12  ;;  %v5985_v3 = vadd.f32 1.0, %v3424_v41  ;;  %v2363_v16 = vadd.f32 %v5965_v57, %v2362_v33  ;;  %v2413_v46 = vpop.f32.mrf.mxu1 }
 0x20f   : > { %vm1927_vm15 = vweird.f32 %v5848_v27  ;;  %vm1928_vm1 = vweird.f32 %v5913_v17  ;;  %v1949_v2 = vor.u32 1.1754944e-38, %v1948_v39  ;;  %v1953_v55 = vmul.f32 %v3426_v58, %v5918_v43  ;;  %v2462_v63 = vpop.f32.mrf.mxu2  ;;  %vm1944_vm0 = vmor %vm1942_vm12, %vm1943_vm14 }
 0x210   : > { %vm1957_vm4 = vweird.f32 %v5918_v43  ;;  %v1941_v51 = vadd.f32 %v3422_v12, %v1940_v20  ;;  %v1963_v44 = vand.u32 2147483648, %v5918_v43  ;;  %3429 = vrcp.f32 %v5985_v3  ;;  %2489 = vmatmul.bf16.gmra.mxu2 %v2087_v36  ;;  %vm6027_vm10 = vmor %vm1927_vm15, %vm1928_vm1 }
 0x211   : > { %v2088_v56 = vpack.c.bf16 %v5953_v5, %v5783_v59  ;;  %v3428_v34 = vpop.eup %3427  ;;  %v1925_v60 = vmul.f32 %v5913_v17, %v1924_v9  ;;  %v1954_v18 = vsub.f32 1.0, %v1953_v55  ;;  %vm6000_vm2 = vcmp.eq.f32.partialorder %v1961_v40, 8.507059e+37  ;;  %v2514_v9 = vpop.f32.mrf.mxu3 }
 0x212   : > { %v1976_v10 = vand.u32 2147483647, %v5948_v0  ;;  %v1945_v6 = vsel %vm1944_vm0, %v3422_v12, %v1941_v51  ;;  %v1968_v38 = vmul.f32 %v3428_v34, %v5948_v0  ;;  %v2412_v59 = vadd.f32 %v2411_v11, %v2363_v16 }
 0x213   : > { %v2365_v31 = vadd.f32 %v5965_v57, %v2364_v21  ;;  %v1950_v54 = vsel %vm5980_vm13, %v1949_v2, %v1945_v6  ;;  %v1955_v49 = vmul.f32 %v3426_v58, %v1954_v18  ;;  %vm1958_vm6 = vweird.f32 %v3426_v58 }
 0x214   : > { %v1978_v52 = vand.u32 2147483648, %v5948_v0  ;;  %v2057_v33 = vmul.f32 %v1950_v54, %v5736_v48  ;;  %v1969_v37 = vsub.f32 1.0, %v1968_v38  ;;  %v2461_v32 = vadd.f32 %v5933_v14, %v2412_v59  ;;  %vm1959_vm5 = vmor %vm1957_vm4, %vm1958_vm6 }
 0x215   : > { %v2414_v15 = vadd.f32 %v2413_v46, %v2365_v31  ;;  %v1926_v1 = vadd.f32 %v5913_v17, %v1925_v60  ;;  %v1956_v12 = vadd.f32 %v3426_v58, %v1955_v49  ;;  %v1964_v61 = vor.u32 1.1754944e-38, %v1963_v44  ;;  %v2367_v42 = vpop.f32.mrf.mxu0 }
 0x216   : > { %vm1973_vm3 = vweird.f32 %v3428_v34  ;;  %v3430_v11 = vpop.eup %3429  ;;  %v1970_v23 = vmul.f32 %v3428_v34, %v1969_v37  ;;  %v2089_v29 = vpack.c.bf16 %v2057_v33, %v5956_v30  ;;  %v2510_v45 = vadd.f32 %v5935_v35, %v2461_v32  ;;  %v2416_v43 = vpop.f32.mrf.mxu1 }
 0x217   : > { %v2463_v48 = vadd.f32 %v2462_v63, %v2414_v15  ;;  %v1960_v5 = vsel %vm1959_vm5, %v3426_v58, %v1956_v12  ;;  %vm1972_vm7 = vweird.f32 %v5948_v0  ;;  %vm6018_vm8 = vcmp.eq.f32.partialorder %v1976_v10, 8.507059e+37  ;;  %2538 = vmatmul.bf16.gmra.mxu3 %v2088_v56  ;;  %v2465_v41 = vpop.f32.mrf.mxu2 }
 0x218   : > { %v1983_v4 = vmul.f32 %v3430_v11, %v5985_v3  ;;  %v1965_v35 = vsel %vm6000_vm2, %v1964_v61, %v1960_v5  ;;  %v1971_v39 = vadd.f32 %v3428_v34, %v1970_v23  ;;  %v1979_v53 = vor.u32 1.1754944e-38, %v1978_v52  ;;  %2396 = vmatmul.bf16.gmra.mxu0 %v2089_v29  ;;  %2549 = vst [vmem:[%s6035_s16] sm:$0xff] %v2510_v45  ;;  %vm1974_vm11 = vmor %vm1972_vm7, %vm1973_vm3 }
 0x219   : > { %v2368_v36 = vadd.f32 %v5965_v57, %v2367_v42  ;;  %v1930_v26 = vsel %vm6027_vm10, %v5913_v17, %v1926_v1  ;;  %v2058_v40 = vmul.f32 %v1965_v35, %v5790_v62  ;;  %v2512_v20 = vadd.f32 %v2511_v50, %v2463_v48  ;;  %v2516_v7 = vpop.f32.mrf.mxu3 }
 0x21a   : > { %v1984_v58 = vsub.f32 1.0, %v1983_v4  ;;  %v1975_v16 = vsel %vm1974_vm11, %v3428_v34, %v1971_v39  ;;  %v1991_v2 = vand.u32 2147483647, %v5985_v3  ;;  %v1993_v55 = vand.u32 2147483648, %v5985_v3 }
 0x21b   : > { %v2417_v21 = vadd.f32 %v2416_v43, %v2368_v36  ;;  %v1980_v46 = vsel %vm6018_vm8, %v1979_v53, %v1975_v16  ;;  %vm1988_vm9 = vweird.f32 %v3430_v11  ;;  %v2090_v17 = vpack.c.bf16 %v2058_v40, %v5972_v22  ;;  %2550 = vst [vmem:[%s6035_s16 + $0x8] sm:$0xff] %v2512_v20 }
 0x21c   : > { %v1985_v51 = vmul.f32 %v3430_v11, %v1984_v58  ;;  %v2055_v62 = vmul.f32 %v5978_v8, %v5633_v24  ;;  %v1934_v0 = vor.u32 1.1754944e-38, %v1933_v19  ;;  %v2059_v44 = vmul.f32 %v1980_v46, %v5822_v13 }
 0x21d   : > { %v2466_v56 = vadd.f32 %v2465_v41, %v2417_v21  ;;  %vm1932_vm12 = vcmp.eq.f32.partialorder %v1931_v47, 8.507059e+37  ;;  %vm1987_vm13 = vweird.f32 %v5985_v3  ;;  %2445 = vmatmul.bf16.gmra.mxu1 %v2090_v17  ;;  %v1994_v22 = vor.u32 1.1754944e-38, %v1993_v55  ;;  %v2369_v8 = vpop.f32.mrf.mxu0 }
 0x21e   : > { %v1986_v63 = vadd.f32 %v3430_v11, %v1985_v51  ;;  %v1935_v50 = vsel %vm1932_vm12, %v1934_v0, %v1930_v26  ;;  %vm1989_vm14 = vmor %vm1987_vm13, %vm1988_vm9  ;;  %v2091_v34 = vpack.c.bf16 %v2059_v44, %v2055_v62  ;;  %vm1992_vm15 = vcmp.eq.f32.partialorder %v1991_v2, 8.507059e+37  ;;  %v2418_v19 = vpop.f32.mrf.mxu1 }
 0x21f   : > { %v2515_v60 = vadd.f32 %v2514_v9, %v2466_v56  ;;  %v2370_v13 = vadd.f32 %v5965_v57, %v2369_v8  ;;  %v2467_v27 = vpop.f32.mrf.mxu2  ;;  %v2056_v47 = vmul.f32 %v1935_v50, %v5691_v25 }
 0x220   : > { %v1990_v24 = vsel %vm1989_vm14, %v3430_v11, %v1986_v63  ;;  %2494 = vmatmul.bf16.gmra.mxu2 %v2091_v34 }
 0x221   : > { %v1995_v18 = vsel %vm1992_vm15, %v1994_v22, %v1990_v24  ;;  %2551 = vst [vmem:[%s6035_s16 + $0x10] sm:$0xff] %v2515_v60  ;;  %v2419_v10 = vadd.f32 %v2418_v19, %v2370_v13  ;;  %v2519_v37 = vpop.f32.mrf.mxu3 }
 0x222   : > { %v2060_v3 = vmul.f32 %v1995_v18, %v5851_v28 }
 0x223   : > { %v2468_v38 = vadd.f32 %v2467_v27, %v2419_v10 }
 0x224   : > { %v2092_v6 = vpack.c.bf16 %v2060_v3, %v2056_v47 }
 0x225   : > { %v2517_v59 = vadd.f32 %v2516_v7, %v2468_v38  ;;  %v2372_v31 = vpop.f32.mrf.mxu0 }
 0x226   : > { %v2421_v54 = vpop.f32.mrf.mxu1  ;;  %v2373_v49 = vadd.f32 %v5965_v57, %v2372_v31 }
 0x227   : > { %2543 = vmatmul.bf16.gmra.mxu3 %v2092_v6  ;;  %2552 = vst [vmem:[%s6035_s16 + $0x18] sm:$0xff] %v2517_v59  ;;  %v2470_v52 = vpop.f32.mrf.mxu2 }
 0x228   : > { %v2422_v33 = vadd.f32 %v2421_v54, %v2373_v49 }
 0x229   : > { %v2521_v23 = vpop.f32.mrf.mxu3 }
 0x22a   : > { %v2471_v15 = vadd.f32 %v2470_v52, %v2422_v33 }
 0x22c   : > { %v2520_v25 = vadd.f32 %v2519_v37, %v2471_v15 }
 0x22d   : > { %v2374_v32 = vpop.f32.mrf.mxu0 }
 0x22e   : > { %v2375_v28 = vadd.f32 %v5965_v57, %v2374_v32  ;;  %2553 = vst [vmem:[%s6035_s16 + $0x20] sm:$0xff] %v2520_v25  ;;  %v2423_v1 = vpop.f32.mrf.mxu1 }
 0x22f   : > { %v2472_v12 = vpop.f32.mrf.mxu2 }
 0x230   : > { %v2424_v61 = vadd.f32 %v2423_v1, %v2375_v28 }
 0x232   : > { %v2473_v11 = vadd.f32 %v2472_v12, %v2424_v61 }
 0x234   : > { %v2522_v29 = vadd.f32 %v2521_v23, %v2473_v11 }
 0x235   : > { %v2377_v45 = vpop.f32.mrf.mxu0 }
 0x236   : > { %2554 = vst [vmem:[%s6035_s16 + $0x28] sm:$0xff] %v2522_v29  ;;  %v2378_v48 = vadd.f32 %v5965_v57, %v2377_v45  ;;  %v2426_v5 = vpop.f32.mrf.mxu1 }
 0x238   : > { %v2427_v4 = vadd.f32 %v2426_v5, %v2378_v48 }
 0x23d   : > { %v2379_v42 = vpop.f32.mrf.mxu0 }
 0x23e   : > { %v2380_v30 = vadd.f32 %v5965_v57, %v2379_v42  ;;  %v2428_v53 = vpop.f32.mrf.mxu1 }
 0x240   : > { %v2429_v41 = vadd.f32 %v2428_v53, %v2380_v30 }
 0x249   : > { %v2475_v14 = vpop.f32.mrf.mxu2 }
 0x24a   : > { %v2476_v43 = vadd.f32 %v2475_v14, %v2427_v4  ;;  %v2382_v26 = vpop.f32.mrf.mxu0 }
 0x24b   : > { %v2383_v20 = vadd.f32 %v5965_v57, %v2382_v26  ;;  %v2431_v16 = vpop.f32.mrf.mxu1 }
 0x24d   : > { %v2432_v2 = vadd.f32 %v2431_v16, %v2383_v20 }
 0x251   : > { %v2477_v36 = vpop.f32.mrf.mxu2 }
 0x252   : > { %v2524_v35 = vpop.f32.mrf.mxu3  ;;  %v2478_v9 = vadd.f32 %v2477_v36, %v2429_v41  ;;  %v2384_v55 = vpop.f32.mrf.mxu0 }
 0x253   : > { %v2525_v39 = vadd.f32 %v2524_v35, %v2476_v43  ;;  %v2385_v17 = vadd.f32 %v5965_v57, %v2384_v55  ;;  %v2433_v0 = vpop.f32.mrf.mxu1 }
 0x255   : > { %2555 = vst [vmem:[%s6035_s16 + $0x30] sm:$0xff] %v2525_v39  ;;  %v2434_v44 = vadd.f32 %v2433_v0, %v2385_v17 }
 0x25a   : > { %v2526_v40 = vpop.f32.mrf.mxu3 }
 0x25b   : > { %v2527_v58 = vadd.f32 %v2526_v40, %v2478_v9 }
 0x25d   : > { %2556 = vst [vmem:[%s6035_s16 + $0x38] sm:$0xff] %v2527_v58 }
 0x264   : > { %v2480_v21 = vpop.f32.mrf.mxu2 }
 0x265   : > { %v2529_v46 = vpop.f32.mrf.mxu3  ;;  %v2481_v51 = vadd.f32 %v2480_v21, %v2432_v2 }
 0x267   : > { %v2530_v62 = vadd.f32 %v2529_v46, %v2481_v51 }
 0x269   : > { %2557 = vst [vmem:[%s6035_s16 + $0x40] sm:$0xff] %v2530_v62 }
 0x26c   : > { %v2482_v56 = vpop.f32.mrf.mxu2 }
 0x26d   : > { %v2483_v63 = vadd.f32 %v2482_v56, %v2434_v44  ;;  %v2531_v50 = vpop.f32.mrf.mxu3 }
 0x26f   : > { %v2532_v22 = vadd.f32 %v2531_v50, %v2483_v63  ;;  %v2387_v34 = vpop.f32.mrf.mxu0 }
 0x270   : > { %v2388_v8 = vadd.f32 %v5965_v57, %v2387_v34 }
 0x271   : > { %2558 = vst [vmem:[%s6035_s16 + $0x48] sm:$0xff] %v2532_v22 }
 0x277   : > { %v2389_v24 = vpop.f32.mrf.mxu0 }
 0x278   : > { %v2390_v3 = vadd.f32 %v5965_v57, %v2389_v24 }
 0x279   : > { %v2436_v60 = vpop.f32.mrf.mxu1 }
 0x27a   : > { %v2437_v13 = vadd.f32 %v2436_v60, %v2388_v8 }
 0x281   : > { %v2438_v18 = vpop.f32.mrf.mxu1 }
 0x282   : > { %v2439_v38 = vadd.f32 %v2438_v18, %v2390_v3 }
 0x283   : > { %v2485_v19 = vpop.f32.mrf.mxu2 }
 0x284   : > { %v2486_v27 = vadd.f32 %v2485_v19, %v2437_v13  ;;  %v2392_v47 = vpop.f32.mrf.mxu0 }
 0x285   : > { %v2393_v54 = vadd.f32 %v5965_v57, %v2392_v47 }
 0x289   : > { %v2441_v59 = vpop.f32.mrf.mxu1 }
 0x28a   : > { %v2534_v7 = vpop.f32.mrf.mxu3  ;;  %v2442_v15 = vadd.f32 %v2441_v59, %v2393_v54 }
 0x28b   : > { %v2535_v10 = vadd.f32 %v2534_v7, %v2486_v27  ;;  %v2487_v6 = vpop.f32.mrf.mxu2 }
 0x28c   : > { %v2488_v31 = vadd.f32 %v2487_v6, %v2439_v38  ;;  %v2394_v52 = vpop.f32.mrf.mxu0 }
 0x28d   : > { %2559 = vst [vmem:[%s6035_s16 + $0x50] sm:$0xff] %v2535_v10  ;;  %v2395_v28 = vadd.f32 %v5965_v57, %v2394_v52 }
 0x291   : > { %v2443_v32 = vpop.f32.mrf.mxu1 }
 0x292   : > { %v2536_v49 = vpop.f32.mrf.mxu3  ;;  %v2444_v23 = vadd.f32 %v2443_v32, %v2395_v28 }
 0x293   : > { %v2537_v33 = vadd.f32 %v2536_v49, %v2488_v31  ;;  %v2490_v37 = vpop.f32.mrf.mxu2 }
 0x294   : > { %v2491_v25 = vadd.f32 %v2490_v37, %v2442_v15 }
 0x295   : > { %2560 = vst [vmem:[%s6035_s16 + $0x58] sm:$0xff] %v2537_v33  ;;  %v2397_v11 = vpop.f32.mrf.mxu0 }
 0x296   : > { %v2398_v45 = vadd.f32 %v5965_v57, %v2397_v11 }
 0x29a   : > { %v2539_v1 = vpop.f32.mrf.mxu3  ;;  %v2446_v48 = vpop.f32.mrf.mxu1 }
 0x29b   : > { %v2540_v12 = vadd.f32 %v2539_v1, %v2491_v25  ;;  %v2492_v61 = vpop.f32.mrf.mxu2  ;;  %v2447_v42 = vadd.f32 %v2446_v48, %v2398_v45 }
 0x29c   : > { %v2493_v29 = vadd.f32 %v2492_v61, %v2444_v23 }
 0x29d   : > { %2561 = vst [vmem:[%s6035_s16 + $0x60] sm:$0xff] %v2540_v12  ;;  %v2399_v43 = vpop.f32.mrf.mxu0 }
 0x29e   : > { %v2400_v35 = vadd.f32 %v5965_v57, %v2399_v43 }
 0x2a2   : > { %v2541_v5 = vpop.f32.mrf.mxu3  ;;  %v2448_v36 = vpop.f32.mrf.mxu1 }
 0x2a3   : > { %v2542_v14 = vadd.f32 %v2541_v5, %v2493_v29  ;;  %v2495_v4 = vpop.f32.mrf.mxu2  ;;  %v2449_v9 = vadd.f32 %v2448_v36, %v2400_v35 }
 0x2a4   : > { %v2496_v30 = vadd.f32 %v2495_v4, %v2447_v42 }
 0x2a5   : > { %2562 = vst [vmem:[%s6035_s16 + $0x68] sm:$0xff] %v2542_v14 }
 0x2aa   : > { %v2544_v39 = vpop.f32.mrf.mxu3 }
 0x2ab   : > { %v2545_v53 = vadd.f32 %v2544_v39, %v2496_v30  ;;  %v2497_v41 = vpop.f32.mrf.mxu2 }
 0x2ac   : > { %v2498_v26 = vadd.f32 %v2497_v41, %v2449_v9 }
 0x2ad   : > { %2563 = vst [vmem:[%s6035_s16 + $0x70] sm:$0xff] %v2545_v53 }
 0x2b2   : > { %v2546_v40 = vpop.f32.mrf.mxu3 }
 0x2b3   : > { %v2547_v57 = vadd.f32 %v2546_v40, %v2498_v26 }
 0x2b5   : > { %2564 = vst [vmem:[%s6035_s16 + $0x78] sm:$0xff] %v2547_v57 }
 0x2b6   : > { %3578 = shalt.err (!%p3575_p10)
}
 0x2b7   : > { %s3636_s17 = smov 128   ;;  %s3637_s29 = smov 8  }
 0x2b8   : > { %3103 = dma.vmem_to_hbm [thread:$0]  (%p3750_p5), %s2579_s12, 2048, %s2581_s13, %s2566_s22, %s3636_s17, %s3636_s17, %s3637_s29  }
 0x2b9 PF: > { %p3130_p11 = scmp.ge.s32.totalorder %s3625_s21, 2  ;;  %s2595_s16 = sand.u32 1, %s3613_s18  }
 0x2ba   : > { %s2596_s23 = scalar_lea.sflag [#allocation4], %s2595_s16 }
 0x2bb   : > { %p3120_p12 = pnand %p3130_p11, %p3703_p6 }
 0x2bd   : > { %p3121_p13 = pneg %p3120_p12 }
 0x2bf   : > { %3608 = dma.done.wait (%p3121_p13), %s2596_s23, 2048  }
 0x2c0   : > { %3610 = vsyncadd (%p3121_p13), %s2596_s23, 4294965248  ;;  %p20_p0 = scmp.ge.s32.totalorder %s3736_s30, 6   ;;  %s6373_s18 = smov %s3617_s19 }
 0x2c1   : > { %s6374_s19 = smov %s3621_s20  ;;  %s6375_s20 = smov %s3746_s9 }
 0x2c2   : > { %s6376_s21 = smov %s3736_s30  ;;  %22 = sbr.rel (!%p20_p0) target bundleno = 7 (0x7), region = 97 }
 0x2c7   :  { %2602 = vsyncpa [#allocation3], 1 }
 0x2c8   :  { %2604 = vsyncpa [#allocation3 + $0x1], 1 }
 0x2c9   :  { %2605 = vsyncpa [#allocation6], 1 }
 0x2ca   :  { %2606 = vsyncpa [#allocation9], 1 }
 0x2cb   :  { %2607 = vsyncpa [#allocation4], 1 }
 0x2cc   :  { %2609 = vsyncpa [#allocation4 + $0x1], 1 }

</bundles_post_ra>
